<compile_context>
chip_gen: v7x
topology: tpu7x:2x2x1
jax: 0.10.0
libtpu: 0.0.40
codegen_flags: <defaults>
</compile_context>

<pallas_src>
import functools

import jax
import jax.numpy as jnp
from jax.experimental import pallas as pl
from jax.experimental.pallas import tpu as pltpu


# ----------------------------------------------------------------------------- kernel
def _tsgcn_kernel(x_ref, w_enc_ref, b_enc_ref, emb_ref, p_fwd_ref, p_bwd_ref,
                  w_cd_ref, b_cd_ref, o_ref, xrow_ref, zt_ref, zcat_ref,
                  *, alpha, beta, thr, k_hops, use_spike):
    Bt, T, _, NF = x_ref.shape
    F, H = w_enc_ref.shape
    N = emb_ref.shape[0]

    # ---- de-interleave the lane-dense x block (Bt, T, 1, N*F) into an
    # F-minor scratch via static slice stores.  Keeps the inbound DMA
    # unit-stride and the pipeline buffers small, while giving the encoder a
    # plain (rows, F) operand without relying on a lane-splitting reshape.
    # TODO(synk): for large N, tile this over T / fold into a loop.
    for n in range(N):
        xrow_ref[:, :, n:n + 1, :] = x_ref[:, :, :, n * F:(n + 1) * F]

    # ---- encoder: ONE MXU matmul over all Bt*T*N rows, hoisted out of the
    # temporal recurrence.  DEFAULT matmul precision per review (f32 HIGHEST
    # is ~6x MXU passes); a VPU sum-of-outer-products is the next lever if the
    # MXU slot ever binds on this K=F contraction.
    x_rows = xrow_ref[...].reshape(Bt * T * N, F)
    cur = jnp.dot(x_rows, w_enc_ref[...], preferred_element_type=jnp.float32)
    bias = b_enc_ref[...] + emb_ref[...]                      # (N, H), once
    cur = cur.reshape(Bt, T, N, H) + bias[None, None]

    # ---- SynapticSpike (snntorch Synaptic-style) scan over T: pure VPU work.
    # TODO(synk): if the VPU becomes the binding slot at realistic T, fold the
    # state to a lane-dense (Bt, N*H) layout and use a time-major scratch +
    # lax.fori_loop instead of this static unroll.
    syn = jnp.zeros((Bt, N, H), jnp.float32)
    mem = jnp.zeros((Bt, N, H), jnp.float32)
    for t in range(T):
        reset = (mem > thr).astype(jnp.float32)    # spike of previous step
        syn = alpha * syn + cur[:, t]
        mem = beta * mem + syn - thr * reset       # soft (subtract) reset
    spk = (mem > thr).astype(jnp.float32)          # last-step spikes
    z_in = spk if use_spike else mem               # (Bt, N, H)

    # ---- DiffConv hops, batched over Bt: node-major layout (N, Bt*H) so each
    # hop is ONE (N,N)@(N,Bt*H) matmul for all batch elements.
    for b in range(Bt):
        zt_ref[:, b * H:(b + 1) * H] = z_in[b]
    zt = zt_ref[...]

    p_fwd = p_fwd_ref[...]
    p_bwd = p_bwd_ref[...]
    feats = [zt]                                   # root term (hop 0)
    h = zt
    for _ in range(k_hops):
        h = jnp.dot(p_fwd, h, preferred_element_type=jnp.float32)
        feats.append(h)
    h = zt
    for _ in range(k_hops):
        h = jnp.dot(p_bwd, h, preferred_element_type=jnp.float32)
        feats.append(h)

    # ---- assemble zcat (Bt*N, (2k+1)*H) with slice stores into a VMEM
    # scratch (vst slot) instead of lane-concatenating 32-lane chunks (XLU).
    for i, feat in enumerate(feats):
        for b in range(Bt):
            zcat_ref[b * N:(b + 1) * N, i * H:(i + 1) * H] = (
                feat[:, b * H:(b + 1) * H])

    # ---- fused DiffConv-filter + decoder matmul (no activation between
    # space_nn and decoder in the reference forward), direct (b, n)-major
    # store that matches the output tiling.
    out = jnp.dot(zcat_ref[...], w_cd_ref[...],
                  preferred_element_type=jnp.float32)
    out = out + b_cd_ref[...]                      # (Bt*N, F*horizon)
    o_ref[...] = out.astype(o_ref.dtype)


# ----------------------------------------------------------------------------- helpers
def _round_up(x, m):
    return (x + m - 1) // m * m


def _padded_f32_bytes(shape):
    """Rough f32 VMEM footprint with (8, 128) padding on the last two dims."""
    if len(shape) < 2:
        return _round_up(int(shape[0]) if shape else 1, 128) * 4
    lead = 1
    for d in shape[:-2]:
        lead *= int(d)
    return lead * _round_up(int(shape[-2]), 8) * _round_up(int(shape[-1]), 128) * 4


def _vmem_estimate_bytes(bt, T, N, F, H, n_filters, fh):
    total = 0
    total += 2 * _padded_f32_bytes((bt, T, 1, N * F))        # x block (double buffered)
    total += 2 * _padded_f32_bytes((bt * N, fh))             # out block (double buffered)
    for s in ((F, H), (1, H), (N, H), (N, N), (N, N),
              (n_filters * H, fh), (1, fh)):
        total += _padded_f32_bytes(s)                        # single-buffered constants
    total += _padded_f32_bytes((bt, T, N, F))                # xrow scratch
    total += _padded_f32_bytes((N, bt * H))                  # zt scratch
    total += _padded_f32_bytes((bt * N, n_filters * H))      # zcat scratch
    total += 4 * _padded_f32_bytes((bt, T, N, H))            # cur + live temporaries
    return total


def _pick_batch_tile(B, T, N, F, H, n_filters, fh, vmem_budget):
    """Largest divisor of B whose VMEM estimate fits the budget.  No forced
    >=2 grid steps: extra steps are pure overhead on single-TC v5e/v6e."""
    best = 1
    for d in range(1, B + 1):
        if B % d == 0 and _vmem_estimate_bytes(d, T, N, F, H, n_filters,
                                               fh) <= vmem_budget:
            best = d
    return best


def _const_spec(shape):
    """Spec for an operand whose block never changes across the grid:
    single-buffer it so resident weights/supports don't pay 2x VMEM.  Falls
    back to the default spec if this build doesn't expose pipeline_mode."""
    index_map = lambda b: (0,) * len(shape)
    try:
        return pl.BlockSpec(shape, index_map, pipeline_mode=pl.Buffered(1))
    except (TypeError, AttributeError):
        return pl.BlockSpec(shape, index_map)


def diffconv_supports(edge_index, edge_weight, n_nodes):
    """Dense normalized fwd/bwd transition matrices: y = P @ x with
    y_i = sum_{j->i} (w_ji / in_deg(i)) x_j.
    TODO(synk): verify against tsl DiffConv's exact normalization convention
    (out-degree row-normalized forward / transposed backward vs this one)."""
    src, tgt = edge_index[0], edge_index[1]

    def norm_dense(s, t, w):
        deg = jnp.zeros((n_nodes,), jnp.float32).at[t].add(w)
        deg_inv = jnp.where(deg > 0, 1.0 / deg, 0.0)
        w_n = w * deg_inv[t]
        return jnp.zeros((n_nodes, n_nodes), jnp.float32).at[t, s].add(w_n)

    p_fwd = norm_dense(src, tgt, edge_weight)
    p_bwd = norm_dense(tgt, src, edge_weight)   # transposed connectivity
    return p_fwd, p_bwd


def init_params(key, input_size, n_nodes, horizon, hidden_size, gnn_kernel):
    ks = jax.random.split(key, 7)

    def lin(k, fan_in, shape):
        bound = 1.0 / float(fan_in) ** 0.5
        return jax.random.uniform(k, shape, jnp.float32, -bound, bound)

    n_filters = 2 * gnn_kernel + 1
    return dict(
        w_enc=lin(ks[0], input_size, (input_size, hidden_size)),
        b_enc=lin(ks[1], input_size, (1, hidden_size)),
        emb=jax.random.normal(ks[2], (n_nodes, hidden_size), jnp.float32) * 0.1,
        # w_filt rows ordered [root, fwd hop 1..k, bwd hop 1..k], H each.
        w_filt=lin(ks[3], hidden_size * n_filters,
                   (hidden_size * n_filters, hidden_size)),
        b_filt=lin(ks[4], hidden_size * n_filters, (1, hidden_size)),
        # w_dec columns ordered horizon-major, feature-minor ('(t f)').
        w_dec=lin(ks[5], hidden_size, (hidden_size, input_size * horizon)),
        b_dec=lin(ks[6], hidden_size, (1, input_size * horizon)),
    )


# ----------------------------------------------------------------------------- wrapper
def temporal_spike_graph_conv_net(x, edge_index, edge_weight, params, *,
                                  horizon, gnn_kernel=2, alpha=0.9, beta=0.8,
                                  thr=1.0, use_spike_for_output=True,
                                  batch_tile=None):
    B, T, N, F = x.shape
    H = params['w_enc'].shape[1]
    n_filters = 2 * gnn_kernel + 1
    fh = F * horizon

    p_fwd, p_bwd = diffconv_supports(edge_index, edge_weight, N)

    # Fused DiffConv-filter + decoder weights (reference forward applies the
    # decoder directly to space_nn's output, no activation in between).
    w_cd = jnp.dot(params['w_filt'], params['w_dec'])                    # ((2k+1)H, F*hor)
    b_cd = jnp.dot(params['b_filt'], params['w_dec']) + params['b_dec']  # (1, F*hor)

    # Lane-dense x layout for the kernel block: unit-stride DMA, small buffers.
    x_flat = x.reshape(B, T, 1, N * F)

    # Generation-aware VMEM budgeting: query capacity when available,
    # otherwise assume the v7x floor (64 MiB per TensorCore).
    try:
        vmem_cap = int(pltpu.get_tpu_info().vmem_capacity_bytes)
    except Exception:
        vmem_cap = 64 << 20
    vmem_budget = min(int(vmem_cap * 0.75), 100 << 20)

    if batch_tile is None:
        batch_tile = _pick_batch_tile(B, T, N, F, H, n_filters, fh, vmem_budget)
    assert B % batch_tile == 0, (B, batch_tile)

    est = _vmem_estimate_bytes(batch_tile, T, N, F, H, n_filters, fh)
    vmem_limit = int(min(max(2 * est, 32 << 20), vmem_budget))

    kernel = functools.partial(_tsgcn_kernel, alpha=alpha, beta=beta, thr=thr,
                               k_hops=gnn_kernel,
                               use_spike=use_spike_for_output)

    out_flat = pl.pallas_call(
        kernel,
        out_shape=jax.ShapeDtypeStruct((B * N, fh), jnp.float32),
        grid_spec=pltpu.PrefetchScalarGridSpec(
            num_scalar_prefetch=0,
            grid=(B // batch_tile,),
            in_specs=[
                pl.BlockSpec((batch_tile, T, 1, N * F),
                             lambda b: (b, 0, 0, 0)),            # x (lane-dense)
                _const_spec((F, H)),                             # w_enc
                _const_spec((1, H)),                             # b_enc
                _const_spec((N, H)),                             # node embedding
                # TODO(synk): at large N keep P_fwd/P_bwd in HBM
                # (memory_space=pl.ANY + manual make_async_copy of N-row
                # chunks) to stay under v7x's 64 MiB VMEM.
                _const_spec((N, N)),                             # P_fwd
                _const_spec((N, N)),                             # P_bwd
                _const_spec((n_filters * H, fh)),                # fused filt+dec weight
                _const_spec((1, fh)),                            # fused filt+dec bias
            ],
            out_specs=pl.BlockSpec((batch_tile * N, fh), lambda b: (b, 0)),
            scratch_shapes=[
                pltpu.VMEM((batch_tile, T, N, F), jnp.float32),            # xrow
                pltpu.VMEM((N, batch_tile * H), jnp.float32),              # zt
                pltpu.VMEM((batch_tile * N, n_filters * H), jnp.float32),  # zcat
            ]),
        compiler_params=pltpu.CompilerParams(
            # Batch steps are independent.  TODO(synk): on v7x, verify both
            # TensorCores pick this up; otherwise switch to CORE_PARALLEL /
            # pl.core_map with >=2 grid steps per chip.
            dimension_semantics=("parallel",),
            vmem_limit_bytes=vmem_limit),
    )(x_flat, params['w_enc'], params['b_enc'], params['emb'], p_fwd, p_bwd,
      w_cd, b_cd)

    # Rearrange 'b n (t f) -> b t n f' (decoder columns are horizon-major).
    return out_flat.reshape(B, N, horizon, F).transpose(0, 2, 1, 3)


# ----------------------------------------------------------------------------- demo
if __name__ == "__main__":
    key = jax.random.PRNGKey(0)
    k_x, k_w, k_p = jax.random.split(key, 3)

    # Small shapes consistent with the module's forward.
    B, T, N, F, H, HORIZON, K = 2, 8, 16, 4, 32, 3, 2

    x = jax.random.normal(k_x, (B, T, N, F), jnp.float32)

    # Deterministic ring graph over N nodes (both directions).
    idx = jnp.arange(N, dtype=jnp.int32)
    src = jnp.concatenate([idx, (idx + 1) % N])
    tgt = jnp.concatenate([(idx + 1) % N, idx])
    edge_index = jnp.stack([src, tgt])
    edge_weight = jax.random.uniform(k_w, (edge_index.shape[1],),
                                     jnp.float32, 0.5, 1.5)

    params = init_params(k_p, input_size=F, n_nodes=N, horizon=HORIZON,
                         hidden_size=H, gnn_kernel=K)

    out = temporal_spike_graph_conv_net(
        x, edge_index, edge_weight, params,
        horizon=HORIZON, gnn_kernel=K, use_spike_for_output=True)
    out = jax.block_until_ready(out)

    assert out.shape == (B, HORIZON, N, F), out.shape
    assert bool(jnp.all(jnp.isfinite(out)))
    print("KERNEL_OK")
</pallas_src>

<mosaic_0001>
module attributes {stable_mosaic.version = 11 : i64} {
  func.func @_tsgcn_kernel(%arg0: i32, %arg1: memref<2x8x1x64xf32, #tpu.memory_space<vmem>>, %arg2: memref<4x32xf32, #tpu.memory_space<vmem>>, %arg3: memref<1x32xf32, #tpu.memory_space<vmem>>, %arg4: memref<16x32xf32, #tpu.memory_space<vmem>>, %arg5: memref<16x16xf32, #tpu.memory_space<vmem>>, %arg6: memref<16x16xf32, #tpu.memory_space<vmem>>, %arg7: memref<160x12xf32, #tpu.memory_space<vmem>>, %arg8: memref<1x12xf32, #tpu.memory_space<vmem>>, %arg9: memref<32x12xf32, #tpu.memory_space<vmem>>, %arg10: memref<2x8x16x4xf32, #tpu.memory_space<vmem>>, %arg11: memref<16x64xf32, #tpu.memory_space<vmem>>, %arg12: memref<32x160xf32, #tpu.memory_space<vmem>>) attributes {dimension_semantics = [#tpu.dimension_semantics<parallel>], iteration_bounds = array<i64: 1>, scalar_prefetch = 0 : i64, scratch_operands = 3 : i64, tpu.core_type = #tpu.core_type<tc>, window_params = [{transform_indices = @transform_0, window_bounds = array<i64: 2, 8, 1, 64>}, {pipeline_mode = #tpu.pipeline_mode<synchronous>, transform_indices = @transform_1, window_bounds = array<i64: 4, 32>}, {pipeline_mode = #tpu.pipeline_mode<synchronous>, transform_indices = @transform_2, window_bounds = array<i64: 1, 32>}, {pipeline_mode = #tpu.pipeline_mode<synchronous>, transform_indices = @transform_3, window_bounds = array<i64: 16, 32>}, {pipeline_mode = #tpu.pipeline_mode<synchronous>, transform_indices = @transform_4, window_bounds = array<i64: 16, 16>}, {pipeline_mode = #tpu.pipeline_mode<synchronous>, transform_indices = @transform_5, window_bounds = array<i64: 16, 16>}, {pipeline_mode = #tpu.pipeline_mode<synchronous>, transform_indices = @transform_6, window_bounds = array<i64: 160, 12>}, {pipeline_mode = #tpu.pipeline_mode<synchronous>, transform_indices = @transform_7, window_bounds = array<i64: 1, 12>}, {transform_indices = @transform_8, window_bounds = array<i64: 32, 12>}]} {
    %c0 = arith.constant 0 : index
    %c0_0 = arith.constant 0 : index
    %c0_1 = arith.constant 0 : index
    %c0_2 = arith.constant 0 : index
    %0 = vector.load %arg1[%c0, %c0_0, %c0_1, %c0_2] : memref<2x8x1x64xf32, #tpu.memory_space<vmem>>, vector<2x8x1x4xf32>
    %c0_3 = arith.constant 0 : index
    %c0_4 = arith.constant 0 : index
    %c0_5 = arith.constant 0 : index
    %c0_6 = arith.constant 0 : index
    %1 = vector.load %arg10[%c0_3, %c0_4, %c0_5, %c0_6] : memref<2x8x16x4xf32, #tpu.memory_space<vmem>>, vector<2x8x1x4xf32>
    tpu.vector_store %arg10[%c0_3, %c0_4, %c0_5, %c0_6], %0 {strides = array<i32>} : memref<2x8x16x4xf32, #tpu.memory_space<vmem>>, vector<2x8x1x4xf32>,
    %c0_7 = arith.constant 0 : index
    %c0_8 = arith.constant 0 : index
    %c0_9 = arith.constant 0 : index
    %c4 = arith.constant 4 : index
    %2 = vector.load %arg1[%c0_7, %c0_8, %c0_9, %c4] : memref<2x8x1x64xf32, #tpu.memory_space<vmem>>, vector<2x8x1x4xf32>
    %c0_10 = arith.constant 0 : index
    %c0_11 = arith.constant 0 : index
    %c1 = arith.constant 1 : index
    %c0_12 = arith.constant 0 : index
    %3 = vector.load %arg10[%c0_10, %c0_11, %c1, %c0_12] : memref<2x8x16x4xf32, #tpu.memory_space<vmem>>, vector<2x8x1x4xf32>
    tpu.vector_store %arg10[%c0_10, %c0_11, %c1, %c0_12], %2 {strides = array<i32>} : memref<2x8x16x4xf32, #tpu.memory_space<vmem>>, vector<2x8x1x4xf32>,
    %c0_13 = arith.constant 0 : index
    %c0_14 = arith.constant 0 : index
    %c0_15 = arith.constant 0 : index
    %c8 = arith.constant 8 : index
    %4 = vector.load %arg1[%c0_13, %c0_14, %c0_15, %c8] : memref<2x8x1x64xf32, #tpu.memory_space<vmem>>, vector<2x8x1x4xf32>
    %c0_16 = arith.constant 0 : index
    %c0_17 = arith.constant 0 : index
    %c2 = arith.constant 2 : index
    %c0_18 = arith.constant 0 : index
    %5 = vector.load %arg10[%c0_16, %c0_17, %c2, %c0_18] : memref<2x8x16x4xf32, #tpu.memory_space<vmem>>, vector<2x8x1x4xf32>
    tpu.vector_store %arg10[%c0_16, %c0_17, %c2, %c0_18], %4 {strides = array<i32>} : memref<2x8x16x4xf32, #tpu.memory_space<vmem>>, vector<2x8x1x4xf32>,
    %c0_19 = arith.constant 0 : index
    %c0_20 = arith.constant 0 : index
    %c0_21 = arith.constant 0 : index
    %c12 = arith.constant 12 : index
    %6 = vector.load %arg1[%c0_19, %c0_20, %c0_21, %c12] : memref<2x8x1x64xf32, #tpu.memory_space<vmem>>, vector<2x8x1x4xf32>
    %c0_22 = arith.constant 0 : index
    %c0_23 = arith.constant 0 : index
    %c3 = arith.constant 3 : index
    %c0_24 = arith.constant 0 : index
    %7 = vector.load %arg10[%c0_22, %c0_23, %c3, %c0_24] : memref<2x8x16x4xf32, #tpu.memory_space<vmem>>, vector<2x8x1x4xf32>
    tpu.vector_store %arg10[%c0_22, %c0_23, %c3, %c0_24], %6 {strides = array<i32>} : memref<2x8x16x4xf32, #tpu.memory_space<vmem>>, vector<2x8x1x4xf32>,
    %c0_25 = arith.constant 0 : index
    %c0_26 = arith.constant 0 : index
    %c0_27 = arith.constant 0 : index
    %c16 = arith.constant 16 : index
    %8 = vector.load %arg1[%c0_25, %c0_26, %c0_27, %c16] : memref<2x8x1x64xf32, #tpu.memory_space<vmem>>, vector<2x8x1x4xf32>
    %c0_28 = arith.constant 0 : index
    %c0_29 = arith.constant 0 : index
    %c4_30 = arith.constant 4 : index
    %c0_31 = arith.constant 0 : index
    %9 = vector.load %arg10[%c0_28, %c0_29, %c4_30, %c0_31] : memref<2x8x16x4xf32, #tpu.memory_space<vmem>>, vector<2x8x1x4xf32>
    tpu.vector_store %arg10[%c0_28, %c0_29, %c4_30, %c0_31], %8 {strides = array<i32>} : memref<2x8x16x4xf32, #tpu.memory_space<vmem>>, vector<2x8x1x4xf32>,
    %c0_32 = arith.constant 0 : index
    %c0_33 = arith.constant 0 : index
    %c0_34 = arith.constant 0 : index
    %c20 = arith.constant 20 : index
    %10 = vector.load %arg1[%c0_32, %c0_33, %c0_34, %c20] : memref<2x8x1x64xf32, #tpu.memory_space<vmem>>, vector<2x8x1x4xf32>
    %c0_35 = arith.constant 0 : index
    %c0_36 = arith.constant 0 : index
    %c5 = arith.constant 5 : index
    %c0_37 = arith.constant 0 : index
    %11 = vector.load %arg10[%c0_35, %c0_36, %c5, %c0_37] : memref<2x8x16x4xf32, #tpu.memory_space<vmem>>, vector<2x8x1x4xf32>
    tpu.vector_store %arg10[%c0_35, %c0_36, %c5, %c0_37], %10 {strides = array<i32>} : memref<2x8x16x4xf32, #tpu.memory_space<vmem>>, vector<2x8x1x4xf32>,
    %c0_38 = arith.constant 0 : index
    %c0_39 = arith.constant 0 : index
    %c0_40 = arith.constant 0 : index
    %c24 = arith.constant 24 : index
    %12 = vector.load %arg1[%c0_38, %c0_39, %c0_40, %c24] : memref<2x8x1x64xf32, #tpu.memory_space<vmem>>, vector<2x8x1x4xf32>
    %c0_41 = arith.constant 0 : index
    %c0_42 = arith.constant 0 : index
    %c6 = arith.constant 6 : index
    %c0_43 = arith.constant 0 : index
    %13 = vector.load %arg10[%c0_41, %c0_42, %c6, %c0_43] : memref<2x8x16x4xf32, #tpu.memory_space<vmem>>, vector<2x8x1x4xf32>
    tpu.vector_store %arg10[%c0_41, %c0_42, %c6, %c0_43], %12 {strides = array<i32>} : memref<2x8x16x4xf32, #tpu.memory_space<vmem>>, vector<2x8x1x4xf32>,
    %c0_44 = arith.constant 0 : index
    %c0_45 = arith.constant 0 : index
    %c0_46 = arith.constant 0 : index
    %c28 = arith.constant 28 : index
    %14 = vector.load %arg1[%c0_44, %c0_45, %c0_46, %c28] : memref<2x8x1x64xf32, #tpu.memory_space<vmem>>, vector<2x8x1x4xf32>
    %c0_47 = arith.constant 0 : index
    %c0_48 = arith.constant 0 : index
    %c7 = arith.constant 7 : index
    %c0_49 = arith.constant 0 : index
    %15 = vector.load %arg10[%c0_47, %c0_48, %c7, %c0_49] : memref<2x8x16x4xf32, #tpu.memory_space<vmem>>, vector<2x8x1x4xf32>
    tpu.vector_store %arg10[%c0_47, %c0_48, %c7, %c0_49], %14 {strides = array<i32>} : memref<2x8x16x4xf32, #tpu.memory_space<vmem>>, vector<2x8x1x4xf32>,
    %c0_50 = arith.constant 0 : index
    %c0_51 = arith.constant 0 : index
    %c0_52 = arith.constant 0 : index
    %c32 = arith.constant 32 : index
    %16 = vector.load %arg1[%c0_50, %c0_51, %c0_52, %c32] : memref<2x8x1x64xf32, #tpu.memory_space<vmem>>, vector<2x8x1x4xf32>
    %c0_53 = arith.constant 0 : index
    %c0_54 = arith.constant 0 : index
    %c8_55 = arith.constant 8 : index
    %c0_56 = arith.constant 0 : index
    %17 = vector.load %arg10[%c0_53, %c0_54, %c8_55, %c0_56] : memref<2x8x16x4xf32, #tpu.memory_space<vmem>>, vector<2x8x1x4xf32>
    tpu.vector_store %arg10[%c0_53, %c0_54, %c8_55, %c0_56], %16 {strides = array<i32>} : memref<2x8x16x4xf32, #tpu.memory_space<vmem>>, vector<2x8x1x4xf32>,
    %c0_57 = arith.constant 0 : index
    %c0_58 = arith.constant 0 : index
    %c0_59 = arith.constant 0 : index
    %c36 = arith.constant 36 : index
    %18 = vector.load %arg1[%c0_57, %c0_58, %c0_59, %c36] : memref<2x8x1x64xf32, #tpu.memory_space<vmem>>, vector<2x8x1x4xf32>
    %c0_60 = arith.constant 0 : index
    %c0_61 = arith.constant 0 : index
    %c9 = arith.constant 9 : index
    %c0_62 = arith.constant 0 : index
    %19 = vector.load %arg10[%c0_60, %c0_61, %c9, %c0_62] : memref<2x8x16x4xf32, #tpu.memory_space<vmem>>, vector<2x8x1x4xf32>
    tpu.vector_store %arg10[%c0_60, %c0_61, %c9, %c0_62], %18 {strides = array<i32>} : memref<2x8x16x4xf32, #tpu.memory_space<vmem>>, vector<2x8x1x4xf32>,
    %c0_63 = arith.constant 0 : index
    %c0_64 = arith.constant 0 : index
    %c0_65 = arith.constant 0 : index
    %c40 = arith.constant 40 : index
    %20 = vector.load %arg1[%c0_63, %c0_64, %c0_65, %c40] : memref<2x8x1x64xf32, #tpu.memory_space<vmem>>, vector<2x8x1x4xf32>
    %c0_66 = arith.constant 0 : index
    %c0_67 = arith.constant 0 : index
    %c10 = arith.constant 10 : index
    %c0_68 = arith.constant 0 : index
    %21 = vector.load %arg10[%c0_66, %c0_67, %c10, %c0_68] : memref<2x8x16x4xf32, #tpu.memory_space<vmem>>, vector<2x8x1x4xf32>
    tpu.vector_store %arg10[%c0_66, %c0_67, %c10, %c0_68], %20 {strides = array<i32>} : memref<2x8x16x4xf32, #tpu.memory_space<vmem>>, vector<2x8x1x4xf32>,
    %c0_69 = arith.constant 0 : index
    %c0_70 = arith.constant 0 : index
    %c0_71 = arith.constant 0 : index
    %c44 = arith.constant 44 : index
    %22 = vector.load %arg1[%c0_69, %c0_70, %c0_71, %c44] : memref<2x8x1x64xf32, #tpu.memory_space<vmem>>, vector<2x8x1x4xf32>
    %c0_72 = arith.constant 0 : index
    %c0_73 = arith.constant 0 : index
    %c11 = arith.constant 11 : index
    %c0_74 = arith.constant 0 : index
    %23 = vector.load %arg10[%c0_72, %c0_73, %c11, %c0_74] : memref<2x8x16x4xf32, #tpu.memory_space<vmem>>, vector<2x8x1x4xf32>
    tpu.vector_store %arg10[%c0_72, %c0_73, %c11, %c0_74], %22 {strides = array<i32>} : memref<2x8x16x4xf32, #tpu.memory_space<vmem>>, vector<2x8x1x4xf32>,
    %c0_75 = arith.constant 0 : index
    %c0_76 = arith.constant 0 : index
    %c0_77 = arith.constant 0 : index
    %c48 = arith.constant 48 : index
    %24 = vector.load %arg1[%c0_75, %c0_76, %c0_77, %c48] : memref<2x8x1x64xf32, #tpu.memory_space<vmem>>, vector<2x8x1x4xf32>
    %c0_78 = arith.constant 0 : index
    %c0_79 = arith.constant 0 : index
    %c12_80 = arith.constant 12 : index
    %c0_81 = arith.constant 0 : index
    %25 = vector.load %arg10[%c0_78, %c0_79, %c12_80, %c0_81] : memref<2x8x16x4xf32, #tpu.memory_space<vmem>>, vector<2x8x1x4xf32>
    tpu.vector_store %arg10[%c0_78, %c0_79, %c12_80, %c0_81], %24 {strides = array<i32>} : memref<2x8x16x4xf32, #tpu.memory_space<vmem>>, vector<2x8x1x4xf32>,
    %c0_82 = arith.constant 0 : index
    %c0_83 = arith.constant 0 : index
    %c0_84 = arith.constant 0 : index
    %c52 = arith.constant 52 : index
    %26 = vector.load %arg1[%c0_82, %c0_83, %c0_84, %c52] : memref<2x8x1x64xf32, #tpu.memory_space<vmem>>, vector<2x8x1x4xf32>
    %c0_85 = arith.constant 0 : index
    %c0_86 = arith.constant 0 : index
    %c13 = arith.constant 13 : index
    %c0_87 = arith.constant 0 : index
    %27 = vector.load %arg10[%c0_85, %c0_86, %c13, %c0_87] : memref<2x8x16x4xf32, #tpu.memory_space<vmem>>, vector<2x8x1x4xf32>
    tpu.vector_store %arg10[%c0_85, %c0_86, %c13, %c0_87], %26 {strides = array<i32>} : memref<2x8x16x4xf32, #tpu.memory_space<vmem>>, vector<2x8x1x4xf32>,
    %c0_88 = arith.constant 0 : index
    %c0_89 = arith.constant 0 : index
    %c0_90 = arith.constant 0 : index
    %c56 = arith.constant 56 : index
    %28 = vector.load %arg1[%c0_88, %c0_89, %c0_90, %c56] : memref<2x8x1x64xf32, #tpu.memory_space<vmem>>, vector<2x8x1x4xf32>
    %c0_91 = arith.constant 0 : index
    %c0_92 = arith.constant 0 : index
    %c14 = arith.constant 14 : index
    %c0_93 = arith.constant 0 : index
    %29 = vector.load %arg10[%c0_91, %c0_92, %c14, %c0_93] : memref<2x8x16x4xf32, #tpu.memory_space<vmem>>, vector<2x8x1x4xf32>
    tpu.vector_store %arg10[%c0_91, %c0_92, %c14, %c0_93], %28 {strides = array<i32>} : memref<2x8x16x4xf32, #tpu.memory_space<vmem>>, vector<2x8x1x4xf32>,
    %c0_94 = arith.constant 0 : index
    %c0_95 = arith.constant 0 : index
    %c0_96 = arith.constant 0 : index
    %c60 = arith.constant 60 : index
    %30 = vector.load %arg1[%c0_94, %c0_95, %c0_96, %c60] : memref<2x8x1x64xf32, #tpu.memory_space<vmem>>, vector<2x8x1x4xf32>
    %c0_97 = arith.constant 0 : index
    %c0_98 = arith.constant 0 : index
    %c15 = arith.constant 15 : index
    %c0_99 = arith.constant 0 : index
    %31 = vector.load %arg10[%c0_97, %c0_98, %c15, %c0_99] : memref<2x8x16x4xf32, #tpu.memory_space<vmem>>, vector<2x8x1x4xf32>
    tpu.vector_store %arg10[%c0_97, %c0_98, %c15, %c0_99], %30 {strides = array<i32>} : memref<2x8x16x4xf32, #tpu.memory_space<vmem>>, vector<2x8x1x4xf32>,
    %c0_100 = arith.constant 0 : index
    %c0_101 = arith.constant 0 : index
    %c0_102 = arith.constant 0 : index
    %c0_103 = arith.constant 0 : index
    %32 = vector.load %arg10[%c0_100, %c0_101, %c0_102, %c0_103] : memref<2x8x16x4xf32, #tpu.memory_space<vmem>>, vector<2x8x16x4xf32>
    %33 = vector.shape_cast %32 : vector<2x8x16x4xf32> to vector<256x4xf32>
    %c0_104 = arith.constant 0 : index
    %c0_105 = arith.constant 0 : index
    %34 = vector.load %arg2[%c0_104, %c0_105] : memref<4x32xf32, #tpu.memory_space<vmem>>, vector<4x32xf32>
    %cst = arith.constant dense<0.000000e+00> : vector<256x32xf32>
    %35 = tpu.matmul %33, %34, %cst {dimension_numbers = #tpu.dot_dimension_numbers<[1], [0], [0], [1], [0, 0, 1, 1], [], []>} : vector<256x4xf32>, vector<4x32xf32>, vector<256x32xf32> -> vector<256x32xf32>
    %c0_106 = arith.constant 0 : index
    %c0_107 = arith.constant 0 : index
    %36 = vector.load %arg3[%c0_106, %c0_107] : memref<1x32xf32, #tpu.memory_space<vmem>>, vector<1x32xf32>
    %c0_108 = arith.constant 0 : index
    %c0_109 = arith.constant 0 : index
    %37 = vector.load %arg4[%c0_108, %c0_109] : memref<16x32xf32, #tpu.memory_space<vmem>>, vector<16x32xf32>
    %38 = vector.broadcast %36 : vector<1x32xf32> to vector<16x32xf32>
    %39 = arith.addf %38, %37 : vector<16x32xf32>
    %40 = vector.shape_cast %35 : vector<256x32xf32> to vector<2x8x16x32xf32>
    %41 = vector.shape_cast %39 : vector<16x32xf32> to vector<1x1x16x32xf32>
    %42 = vector.broadcast %41 : vector<1x1x16x32xf32> to vector<2x8x16x32xf32>
    %43 = arith.addf %40, %42 : vector<2x8x16x32xf32>
    %cst_110 = arith.constant 0.000000e+00 : f32
    %44 = vector.broadcast %cst_110 : f32 to vector<2x16x32xf32>
    %cst_111 = arith.constant 0.000000e+00 : f32
    %45 = vector.broadcast %cst_111 : f32 to vector<2x16x32xf32>
    %cst_112 = arith.constant 1.000000e+00 : f32
    %46 = vector.broadcast %cst_112 : f32 to vector<2x16x32xf32>
    %47 = arith.cmpf ogt, %45, %46 : vector<2x16x32xf32>
    %48 = arith.extui %47 : vector<2x16x32xi1> to vector<2x16x32xi32>
    %49 = arith.sitofp %48 : vector<2x16x32xi32> to vector<2x16x32xf32>
    %cst_113 = arith.constant 0.899999976 : f32
    %50 = vector.broadcast %cst_113 : f32 to vector<2x16x32xf32>
    %51 = arith.mulf %50, %44 : vector<2x16x32xf32>
    %52 = vector.extract_strided_slice %43 {offsets = [0, 0, 0, 0], sizes = [2, 1, 16, 32], strides = [1, 1, 1, 1]} : vector<2x8x16x32xf32> to vector<2x1x16x32xf32>
    %53 = vector.shape_cast %52 : vector<2x1x16x32xf32> to vector<2x16x32xf32>
    %54 = arith.addf %51, %53 : vector<2x16x32xf32>
    %cst_114 = arith.constant 8.000000e-01 : f32
    %55 = vector.broadcast %cst_114 : f32 to vector<2x16x32xf32>
    %56 = arith.mulf %55, %45 : vector<2x16x32xf32>
    %57 = arith.addf %56, %54 : vector<2x16x32xf32>
    %cst_115 = arith.constant 1.000000e+00 : f32
    %58 = vector.broadcast %cst_115 : f32 to vector<2x16x32xf32>
    %59 = arith.mulf %58, %49 : vector<2x16x32xf32>
    %60 = arith.subf %57, %59 : vector<2x16x32xf32>
    %cst_116 = arith.constant 1.000000e+00 : f32
    %61 = vector.broadcast %cst_116 : f32 to vector<2x16x32xf32>
    %62 = arith.cmpf ogt, %60, %61 : vector<2x16x32xf32>
    %63 = arith.extui %62 : vector<2x16x32xi1> to vector<2x16x32xi32>
    %64 = arith.sitofp %63 : vector<2x16x32xi32> to vector<2x16x32xf32>
    %cst_117 = arith.constant 0.899999976 : f32
    %65 = vector.broadcast %cst_117 : f32 to vector<2x16x32xf32>
    %66 = arith.mulf %65, %54 : vector<2x16x32xf32>
    %67 = vector.extract_strided_slice %43 {offsets = [0, 1, 0, 0], sizes = [2, 1, 16, 32], strides = [1, 1, 1, 1]} : vector<2x8x16x32xf32> to vector<2x1x16x32xf32>
    %68 = vector.shape_cast %67 : vector<2x1x16x32xf32> to vector<2x16x32xf32>
    %69 = arith.addf %66, %68 : vector<2x16x32xf32>
    %cst_118 = arith.constant 8.000000e-01 : f32
    %70 = vector.broadcast %cst_118 : f32 to vector<2x16x32xf32>
    %71 = arith.mulf %70, %60 : vector<2x16x32xf32>
    %72 = arith.addf %71, %69 : vector<2x16x32xf32>
    %cst_119 = arith.constant 1.000000e+00 : f32
    %73 = vector.broadcast %cst_119 : f32 to vector<2x16x32xf32>
    %74 = arith.mulf %73, %64 : vector<2x16x32xf32>
    %75 = arith.subf %72, %74 : vector<2x16x32xf32>
    %cst_120 = arith.constant 1.000000e+00 : f32
    %76 = vector.broadcast %cst_120 : f32 to vector<2x16x32xf32>
    %77 = arith.cmpf ogt, %75, %76 : vector<2x16x32xf32>
    %78 = arith.extui %77 : vector<2x16x32xi1> to vector<2x16x32xi32>
    %79 = arith.sitofp %78 : vector<2x16x32xi32> to vector<2x16x32xf32>
    %cst_121 = arith.constant 0.899999976 : f32
    %80 = vector.broadcast %cst_121 : f32 to vector<2x16x32xf32>
    %81 = arith.mulf %80, %69 : vector<2x16x32xf32>
    %82 = vector.extract_strided_slice %43 {offsets = [0, 2, 0, 0], sizes = [2, 1, 16, 32], strides = [1, 1, 1, 1]} : vector<2x8x16x32xf32> to vector<2x1x16x32xf32>
    %83 = vector.shape_cast %82 : vector<2x1x16x32xf32> to vector<2x16x32xf32>
    %84 = arith.addf %81, %83 : vector<2x16x32xf32>
    %cst_122 = arith.constant 8.000000e-01 : f32
    %85 = vector.broadcast %cst_122 : f32 to vector<2x16x32xf32>
    %86 = arith.mulf %85, %75 : vector<2x16x32xf32>
    %87 = arith.addf %86, %84 : vector<2x16x32xf32>
    %cst_123 = arith.constant 1.000000e+00 : f32
    %88 = vector.broadcast %cst_123 : f32 to vector<2x16x32xf32>
    %89 = arith.mulf %88, %79 : vector<2x16x32xf32>
    %90 = arith.subf %87, %89 : vector<2x16x32xf32>
    %cst_124 = arith.constant 1.000000e+00 : f32
    %91 = vector.broadcast %cst_124 : f32 to vector<2x16x32xf32>
    %92 = arith.cmpf ogt, %90, %91 : vector<2x16x32xf32>
    %93 = arith.extui %92 : vector<2x16x32xi1> to vector<2x16x32xi32>
    %94 = arith.sitofp %93 : vector<2x16x32xi32> to vector<2x16x32xf32>
    %cst_125 = arith.constant 0.899999976 : f32
    %95 = vector.broadcast %cst_125 : f32 to vector<2x16x32xf32>
    %96 = arith.mulf %95, %84 : vector<2x16x32xf32>
    %97 = vector.extract_strided_slice %43 {offsets = [0, 3, 0, 0], sizes = [2, 1, 16, 32], strides = [1, 1, 1, 1]} : vector<2x8x16x32xf32> to vector<2x1x16x32xf32>
    %98 = vector.shape_cast %97 : vector<2x1x16x32xf32> to vector<2x16x32xf32>
    %99 = arith.addf %96, %98 : vector<2x16x32xf32>
    %cst_126 = arith.constant 8.000000e-01 : f32
    %100 = vector.broadcast %cst_126 : f32 to vector<2x16x32xf32>
    %101 = arith.mulf %100, %90 : vector<2x16x32xf32>
    %102 = arith.addf %101, %99 : vector<2x16x32xf32>
    %cst_127 = arith.constant 1.000000e+00 : f32
    %103 = vector.broadcast %cst_127 : f32 to vector<2x16x32xf32>
    %104 = arith.mulf %103, %94 : vector<2x16x32xf32>
    %105 = arith.subf %102, %104 : vector<2x16x32xf32>
    %cst_128 = arith.constant 1.000000e+00 : f32
    %106 = vector.broadcast %cst_128 : f32 to vector<2x16x32xf32>
    %107 = arith.cmpf ogt, %105, %106 : vector<2x16x32xf32>
    %108 = arith.extui %107 : vector<2x16x32xi1> to vector<2x16x32xi32>
    %109 = arith.sitofp %108 : vector<2x16x32xi32> to vector<2x16x32xf32>
    %cst_129 = arith.constant 0.899999976 : f32
    %110 = vector.broadcast %cst_129 : f32 to vector<2x16x32xf32>
    %111 = arith.mulf %110, %99 : vector<2x16x32xf32>
    %112 = vector.extract_strided_slice %43 {offsets = [0, 4, 0, 0], sizes = [2, 1, 16, 32], strides = [1, 1, 1, 1]} : vector<2x8x16x32xf32> to vector<2x1x16x32xf32>
    %113 = vector.shape_cast %112 : vector<2x1x16x32xf32> to vector<2x16x32xf32>
    %114 = arith.addf %111, %113 : vector<2x16x32xf32>
    %cst_130 = arith.constant 8.000000e-01 : f32
    %115 = vector.broadcast %cst_130 : f32 to vector<2x16x32xf32>
    %116 = arith.mulf %115, %105 : vector<2x16x32xf32>
    %117 = arith.addf %116, %114 : vector<2x16x32xf32>
    %cst_131 = arith.constant 1.000000e+00 : f32
    %118 = vector.broadcast %cst_131 : f32 to vector<2x16x32xf32>
    %119 = arith.mulf %118, %109 : vector<2x16x32xf32>
    %120 = arith.subf %117, %119 : vector<2x16x32xf32>
    %cst_132 = arith.constant 1.000000e+00 : f32
    %121 = vector.broadcast %cst_132 : f32 to vector<2x16x32xf32>
    %122 = arith.cmpf ogt, %120, %121 : vector<2x16x32xf32>
    %123 = arith.extui %122 : vector<2x16x32xi1> to vector<2x16x32xi32>
    %124 = arith.sitofp %123 : vector<2x16x32xi32> to vector<2x16x32xf32>
    %cst_133 = arith.constant 0.899999976 : f32
    %125 = vector.broadcast %cst_133 : f32 to vector<2x16x32xf32>
    %126 = arith.mulf %125, %114 : vector<2x16x32xf32>
    %127 = vector.extract_strided_slice %43 {offsets = [0, 5, 0, 0], sizes = [2, 1, 16, 32], strides = [1, 1, 1, 1]} : vector<2x8x16x32xf32> to vector<2x1x16x32xf32>
    %128 = vector.shape_cast %127 : vector<2x1x16x32xf32> to vector<2x16x32xf32>
    %129 = arith.addf %126, %128 : vector<2x16x32xf32>
    %cst_134 = arith.constant 8.000000e-01 : f32
    %130 = vector.broadcast %cst_134 : f32 to vector<2x16x32xf32>
    %131 = arith.mulf %130, %120 : vector<2x16x32xf32>
    %132 = arith.addf %131, %129 : vector<2x16x32xf32>
    %cst_135 = arith.constant 1.000000e+00 : f32
    %133 = vector.broadcast %cst_135 : f32 to vector<2x16x32xf32>
    %134 = arith.mulf %133, %124 : vector<2x16x32xf32>
    %135 = arith.subf %132, %134 : vector<2x16x32xf32>
    %cst_136 = arith.constant 1.000000e+00 : f32
    %136 = vector.broadcast %cst_136 : f32 to vector<2x16x32xf32>
    %137 = arith.cmpf ogt, %135, %136 : vector<2x16x32xf32>
    %138 = arith.extui %137 : vector<2x16x32xi1> to vector<2x16x32xi32>
    %139 = arith.sitofp %138 : vector<2x16x32xi32> to vector<2x16x32xf32>
    %cst_137 = arith.constant 0.899999976 : f32
    %140 = vector.broadcast %cst_137 : f32 to vector<2x16x32xf32>
    %141 = arith.mulf %140, %129 : vector<2x16x32xf32>
    %142 = vector.extract_strided_slice %43 {offsets = [0, 6, 0, 0], sizes = [2, 1, 16, 32], strides = [1, 1, 1, 1]} : vector<2x8x16x32xf32> to vector<2x1x16x32xf32>
    %143 = vector.shape_cast %142 : vector<2x1x16x32xf32> to vector<2x16x32xf32>
    %144 = arith.addf %141, %143 : vector<2x16x32xf32>
    %cst_138 = arith.constant 8.000000e-01 : f32
    %145 = vector.broadcast %cst_138 : f32 to vector<2x16x32xf32>
    %146 = arith.mulf %145, %135 : vector<2x16x32xf32>
    %147 = arith.addf %146, %144 : vector<2x16x32xf32>
    %cst_139 = arith.constant 1.000000e+00 : f32
    %148 = vector.broadcast %cst_139 : f32 to vector<2x16x32xf32>
    %149 = arith.mulf %148, %139 : vector<2x16x32xf32>
    %150 = arith.subf %147, %149 : vector<2x16x32xf32>
    %cst_140 = arith.constant 1.000000e+00 : f32
    %151 = vector.broadcast %cst_140 : f32 to vector<2x16x32xf32>
    %152 = arith.cmpf ogt, %150, %151 : vector<2x16x32xf32>
    %153 = arith.extui %152 : vector<2x16x32xi1> to vector<2x16x32xi32>
    %154 = arith.sitofp %153 : vector<2x16x32xi32> to vector<2x16x32xf32>
    %cst_141 = arith.constant 0.899999976 : f32
    %155 = vector.broadcast %cst_141 : f32 to vector<2x16x32xf32>
    %156 = arith.mulf %155, %144 : vector<2x16x32xf32>
    %157 = vector.extract_strided_slice %43 {offsets = [0, 7, 0, 0], sizes = [2, 1, 16, 32], strides = [1, 1, 1, 1]} : vector<2x8x16x32xf32> to vector<2x1x16x32xf32>
    %158 = vector.shape_cast %157 : vector<2x1x16x32xf32> to vector<2x16x32xf32>
    %159 = arith.addf %156, %158 : vector<2x16x32xf32>
    %cst_142 = arith.constant 8.000000e-01 : f32
    %160 = vector.broadcast %cst_142 : f32 to vector<2x16x32xf32>
    %161 = arith.mulf %160, %150 : vector<2x16x32xf32>
    %162 = arith.addf %161, %159 : vector<2x16x32xf32>
    %cst_143 = arith.constant 1.000000e+00 : f32
    %163 = vector.broadcast %cst_143 : f32 to vector<2x16x32xf32>
    %164 = arith.mulf %163, %154 : vector<2x16x32xf32>
    %165 = arith.subf %162, %164 : vector<2x16x32xf32>
    %cst_144 = arith.constant 1.000000e+00 : f32
    %166 = vector.broadcast %cst_144 : f32 to vector<2x16x32xf32>
    %167 = arith.cmpf ogt, %165, %166 : vector<2x16x32xf32>
    %168 = arith.extui %167 : vector<2x16x32xi1> to vector<2x16x32xi32>
    %169 = arith.sitofp %168 : vector<2x16x32xi32> to vector<2x16x32xf32>
    %170 = vector.extract_strided_slice %169 {offsets = [0, 0, 0], sizes = [1, 16, 32], strides = [1, 1, 1]} : vector<2x16x32xf32> to vector<1x16x32xf32>
    %171 = vector.shape_cast %170 : vector<1x16x32xf32> to vector<16x32xf32>
    %c0_145 = arith.constant 0 : index
    %c0_146 = arith.constant 0 : index
    %172 = vector.load %arg11[%c0_145, %c0_146] : memref<16x64xf32, #tpu.memory_space<vmem>>, vector<16x32xf32>
    tpu.vector_store %arg11[%c0_145, %c0_146], %171 {strides = array<i32>} : memref<16x64xf32, #tpu.memory_space<vmem>>, vector<16x32xf32>,
    %173 = vector.extract_strided_slice %169 {offsets = [1, 0, 0], sizes = [1, 16, 32], strides = [1, 1, 1]} : vector<2x16x32xf32> to vector<1x16x32xf32>
    %174 = vector.shape_cast %173 : vector<1x16x32xf32> to vector<16x32xf32>
    %c0_147 = arith.constant 0 : index
    %c32_148 = arith.constant 32 : index
    %175 = vector.load %arg11[%c0_147, %c32_148] : memref<16x64xf32, #tpu.memory_space<vmem>>, vector<16x32xf32>
    tpu.vector_store %arg11[%c0_147, %c32_148], %174 {strides = array<i32>} : memref<16x64xf32, #tpu.memory_space<vmem>>, vector<16x32xf32>,
    %c0_149 = arith.constant 0 : index
    %c0_150 = arith.constant 0 : index
    %176 = vector.load %arg11[%c0_149, %c0_150] : memref<16x64xf32, #tpu.memory_space<vmem>>, vector<16x64xf32>
    %c0_151 = arith.constant 0 : index
    %c0_152 = arith.constant 0 : index
    %177 = vector.load %arg5[%c0_151, %c0_152] : memref<16x16xf32, #tpu.memory_space<vmem>>, vector<16x16xf32>
    %c0_153 = arith.constant 0 : index
    %c0_154 = arith.constant 0 : index
    %178 = vector.load %arg6[%c0_153, %c0_154] : memref<16x16xf32, #tpu.memory_space<vmem>>, vector<16x16xf32>
    %cst_155 = arith.constant dense<0.000000e+00> : vector<16x64xf32>
    %179 = tpu.matmul %177, %176, %cst_155 {dimension_numbers = #tpu.dot_dimension_numbers<[1], [0], [0], [1], [0, 0, 1, 1], [], []>} : vector<16x16xf32>, vector<16x64xf32>, vector<16x64xf32> -> vector<16x64xf32>
    %cst_156 = arith.constant dense<0.000000e+00> : vector<16x64xf32>
    %180 = tpu.matmul %177, %179, %cst_156 {dimension_numbers = #tpu.dot_dimension_numbers<[1], [0], [0], [1], [0, 0, 1, 1], [], []>} : vector<16x16xf32>, vector<16x64xf32>, vector<16x64xf32> -> vector<16x64xf32>
    %cst_157 = arith.constant dense<0.000000e+00> : vector<16x64xf32>
    %181 = tpu.matmul %178, %176, %cst_157 {dimension_numbers = #tpu.dot_dimension_numbers<[1], [0], [0], [1], [0, 0, 1, 1], [], []>} : vector<16x16xf32>, vector<16x64xf32>, vector<16x64xf32> -> vector<16x64xf32>
    %cst_158 = arith.constant dense<0.000000e+00> : vector<16x64xf32>
    %182 = tpu.matmul %178, %181, %cst_158 {dimension_numbers = #tpu.dot_dimension_numbers<[1], [0], [0], [1], [0, 0, 1, 1], [], []>} : vector<16x16xf32>, vector<16x64xf32>, vector<16x64xf32> -> vector<16x64xf32>
    %183 = vector.extract_strided_slice %176 {offsets = [0, 0], sizes = [16, 32], strides = [1, 1]} : vector<16x64xf32> to vector<16x32xf32>
    %c0_159 = arith.constant 0 : index
    %c0_160 = arith.constant 0 : index
    %184 = vector.load %arg12[%c0_159, %c0_160] : memref<32x160xf32, #tpu.memory_space<vmem>>, vector<16x32xf32>
    tpu.vector_store %arg12[%c0_159, %c0_160], %183 {strides = array<i32>} : memref<32x160xf32, #tpu.memory_space<vmem>>, vector<16x32xf32>,
    %185 = vector.extract_strided_slice %176 {offsets = [0, 32], sizes = [16, 32], strides = [1, 1]} : vector<16x64xf32> to vector<16x32xf32>
    %c16_161 = arith.constant 16 : index
    %c0_162 = arith.constant 0 : index
    %186 = vector.load %arg12[%c16_161, %c0_162] : memref<32x160xf32, #tpu.memory_space<vmem>>, vector<16x32xf32>
    tpu.vector_store %arg12[%c16_161, %c0_162], %185 {strides = array<i32>} : memref<32x160xf32, #tpu.memory_space<vmem>>, vector<16x32xf32>,
    %187 = vector.extract_strided_slice %179 {offsets = [0, 0], sizes = [16, 32], strides = [1, 1]} : vector<16x64xf32> to vector<16x32xf32>
    %c0_163 = arith.constant 0 : index
    %c32_164 = arith.constant 32 : index
    %188 = vector.load %arg12[%c0_163, %c32_164] : memref<32x160xf32, #tpu.memory_space<vmem>>, vector<16x32xf32>
    tpu.vector_store %arg12[%c0_163, %c32_164], %187 {strides = array<i32>} : memref<32x160xf32, #tpu.memory_space<vmem>>, vector<16x32xf32>,
    %189 = vector.extract_strided_slice %179 {offsets = [0, 32], sizes = [16, 32], strides = [1, 1]} : vector<16x64xf32> to vector<16x32xf32>
    %c16_165 = arith.constant 16 : index
    %c32_166 = arith.constant 32 : index
    %190 = vector.load %arg12[%c16_165, %c32_166] : memref<32x160xf32, #tpu.memory_space<vmem>>, vector<16x32xf32>
    tpu.vector_store %arg12[%c16_165, %c32_166], %189 {strides = array<i32>} : memref<32x160xf32, #tpu.memory_space<vmem>>, vector<16x32xf32>,
    %191 = vector.extract_strided_slice %180 {offsets = [0, 0], sizes = [16, 32], strides = [1, 1]} : vector<16x64xf32> to vector<16x32xf32>
    %c0_167 = arith.constant 0 : index
    %c64 = arith.constant 64 : index
    %192 = vector.load %arg12[%c0_167, %c64] : memref<32x160xf32, #tpu.memory_space<vmem>>, vector<16x32xf32>
    tpu.vector_store %arg12[%c0_167, %c64], %191 {strides = array<i32>} : memref<32x160xf32, #tpu.memory_space<vmem>>, vector<16x32xf32>,
    %193 = vector.extract_strided_slice %180 {offsets = [0, 32], sizes = [16, 32], strides = [1, 1]} : vector<16x64xf32> to vector<16x32xf32>
    %c16_168 = arith.constant 16 : index
    %c64_169 = arith.constant 64 : index
    %194 = vector.load %arg12[%c16_168, %c64_169] : memref<32x160xf32, #tpu.memory_space<vmem>>, vector<16x32xf32>
    tpu.vector_store %arg12[%c16_168, %c64_169], %193 {strides = array<i32>} : memref<32x160xf32, #tpu.memory_space<vmem>>, vector<16x32xf32>,
    %195 = vector.extract_strided_slice %181 {offsets = [0, 0], sizes = [16, 32], strides = [1, 1]} : vector<16x64xf32> to vector<16x32xf32>
    %c0_170 = arith.constant 0 : index
    %c96 = arith.constant 96 : index
    %196 = vector.load %arg12[%c0_170, %c96] : memref<32x160xf32, #tpu.memory_space<vmem>>, vector<16x32xf32>
    tpu.vector_store %arg12[%c0_170, %c96], %195 {strides = array<i32>} : memref<32x160xf32, #tpu.memory_space<vmem>>, vector<16x32xf32>,
    %197 = vector.extract_strided_slice %181 {offsets = [0, 32], sizes = [16, 32], strides = [1, 1]} : vector<16x64xf32> to vector<16x32xf32>
    %c16_171 = arith.constant 16 : index
    %c96_172 = arith.constant 96 : index
    %198 = vector.load %arg12[%c16_171, %c96_172] : memref<32x160xf32, #tpu.memory_space<vmem>>, vector<16x32xf32>
    tpu.vector_store %arg12[%c16_171, %c96_172], %197 {strides = array<i32>} : memref<32x160xf32, #tpu.memory_space<vmem>>, vector<16x32xf32>,
    %199 = vector.extract_strided_slice %182 {offsets = [0, 0], sizes = [16, 32], strides = [1, 1]} : vector<16x64xf32> to vector<16x32xf32>
    %c0_173 = arith.constant 0 : index
    %c128 = arith.constant 128 : index
    %200 = vector.load %arg12[%c0_173, %c128] : memref<32x160xf32, #tpu.memory_space<vmem>>, vector<16x32xf32>
    tpu.vector_store %arg12[%c0_173, %c128], %199 {strides = array<i32>} : memref<32x160xf32, #tpu.memory_space<vmem>>, vector<16x32xf32>,
    %201 = vector.extract_strided_slice %182 {offsets = [0, 32], sizes = [16, 32], strides = [1, 1]} : vector<16x64xf32> to vector<16x32xf32>
    %c16_174 = arith.constant 16 : index
    %c128_175 = arith.constant 128 : index
    %202 = vector.load %arg12[%c16_174, %c128_175] : memref<32x160xf32, #tpu.memory_space<vmem>>, vector<16x32xf32>
    tpu.vector_store %arg12[%c16_174, %c128_175], %201 {strides = array<i32>} : memref<32x160xf32, #tpu.memory_space<vmem>>, vector<16x32xf32>,
    %c0_176 = arith.constant 0 : index
    %c0_177 = arith.constant 0 : index
    %203 = vector.load %arg12[%c0_176, %c0_177] : memref<32x160xf32, #tpu.memory_space<vmem>>, vector<32x160xf32>
    %c0_178 = arith.constant 0 : index
    %c0_179 = arith.constant 0 : index
    %204 = vector.load %arg7[%c0_178, %c0_179] : memref<160x12xf32, #tpu.memory_space<vmem>>, vector<160x12xf32>
    %cst_180 = arith.constant dense<0.000000e+00> : vector<32x12xf32>
    %205 = tpu.matmul %203, %204, %cst_180 {dimension_numbers = #tpu.dot_dimension_numbers<[1], [0], [0], [1], [0, 0, 1, 1], [], []>} : vector<32x160xf32>, vector<160x12xf32>, vector<32x12xf32> -> vector<32x12xf32>
    %c0_181 = arith.constant 0 : index
    %c0_182 = arith.constant 0 : index
    %206 = vector.load %arg8[%c0_181, %c0_182] : memref<1x12xf32, #tpu.memory_space<vmem>>, vector<1x12xf32>
    %207 = vector.broadcast %206 : vector<1x12xf32> to vector<32x12xf32>
    %208 = arith.addf %205, %207 : vector<32x12xf32>
    %c0_183 = arith.constant 0 : index
    %c0_184 = arith.constant 0 : index
    %209 = vector.load %arg9[%c0_183, %c0_184] : memref<32x12xf32, #tpu.memory_space<vmem>>, vector<32x12xf32>
    tpu.vector_store %arg9[%c0_183, %c0_184], %208 {strides = array<i32>} : memref<32x12xf32, #tpu.memory_space<vmem>>, vector<32x12xf32>,
    return
  }
  func.func @transform_0(%arg0: i32) -> (i32, i32, i32, i32) {
    %c0_i32 = arith.constant 0 : i32
    %c0_i32_0 = arith.constant 0 : i32
    %c0_i32_1 = arith.constant 0 : i32
    %c0_i32_2 = arith.constant 0 : i32
    return %arg0, %c0_i32, %c0_i32_0, %c0_i32_1 : i32, i32, i32, i32
  }
  func.func @transform_1(%arg0: i32) -> (i32, i32) {
    %c0_i32 = arith.constant 0 : i32
    %c0_i32_0 = arith.constant 0 : i32
    %c0_i32_1 = arith.constant 0 : i32
    return %c0_i32, %c0_i32_0 : i32, i32
  }
  func.func @transform_2(%arg0: i32) -> (i32, i32) {
    %c0_i32 = arith.constant 0 : i32
    %c0_i32_0 = arith.constant 0 : i32
    %c0_i32_1 = arith.constant 0 : i32
    return %c0_i32, %c0_i32_0 : i32, i32
  }
  func.func @transform_3(%arg0: i32) -> (i32, i32) {
    %c0_i32 = arith.constant 0 : i32
    %c0_i32_0 = arith.constant 0 : i32
    %c0_i32_1 = arith.constant 0 : i32
    return %c0_i32, %c0_i32_0 : i32, i32
  }
  func.func @transform_4(%arg0: i32) -> (i32, i32) {
    %c0_i32 = arith.constant 0 : i32
    %c0_i32_0 = arith.constant 0 : i32
    %c0_i32_1 = arith.constant 0 : i32
    return %c0_i32, %c0_i32_0 : i32, i32
  }
  func.func @transform_5(%arg0: i32) -> (i32, i32) {
    %c0_i32 = arith.constant 0 : i32
    %c0_i32_0 = arith.constant 0 : i32
    %c0_i32_1 = arith.constant 0 : i32
    return %c0_i32, %c0_i32_0 : i32, i32
  }
  func.func @transform_6(%arg0: i32) -> (i32, i32) {
    %c0_i32 = arith.constant 0 : i32
    %c0_i32_0 = arith.constant 0 : i32
    %c0_i32_1 = arith.constant 0 : i32
    return %c0_i32, %c0_i32_0 : i32, i32
  }
  func.func @transform_7(%arg0: i32) -> (i32, i32) {
    %c0_i32 = arith.constant 0 : i32
    %c0_i32_0 = arith.constant 0 : i32
    %c0_i32_1 = arith.constant 0 : i32
    return %c0_i32, %c0_i32_0 : i32, i32
  }
  func.func @transform_8(%arg0: i32) -> (i32, i32) {
    %c0_i32 = arith.constant 0 : i32
    %c0_i32_0 = arith.constant 0 : i32
    return %arg0, %c0_i32 : i32, i32
  }
}

</mosaic_0001>

<bundles_post_ra>
// kernel: tpu_custom_call.1
= control target key start
LH: loop header
LB: loop body
LE: loop exit
PB: predicated region body
PF: predicated region fallthrough
CT: control target
= control target key end

     0   :  { %s4179_s29 = smov 116   ;;  %s4180_s30 = smov 124   ;;  %vm45_vm0 = vcmask 24576   ;;  %vm2592_vm1 = vcmask 1043456   ;;  %vm2495_vm2 = vcmask 31744   ;;  %s5182_s0 = inlined_call_operand.vmem [shape: f32[2,8,1,64], index: 0, kind: input, shape index: {}]   ;;  %s5183_s1 = inlined_call_operand.vmem [shape: f32[4,32], index: 1, kind: input, shape index: {}]   ;;  %s5184_s2 = inlined_call_operand.vmem [shape: f32[1,32], index: 2, kind: input, shape index: {}]   ;;  %s5185_s3 = inlined_call_operand.vmem [shape: f32[16,32], index: 3, kind: input, shape index: {}]   ;;  %s5186_s4 = inlined_call_operand.vmem [shape: f32[16,16], index: 4, kind: input, shape index: {}]   ;;  %s5187_s5 = inlined_call_operand.vmem [shape: f32[16,16], index: 5, kind: input, shape index: {}]   ;;  %s5188_s6 = inlined_call_operand.vmem [shape: f32[160,12], index: 6, kind: input, shape index: {}]   ;;  %s5189_s7 = inlined_call_operand.vmem [shape: f32[1,12], index: 7, kind: input, shape index: {}]   ;;  %s5190_s8 = inlined_call_operand.vmem [shape: f32[32,12], index: 8, kind: output, shape index: {}]  }
   0x1   :  { %v3695_v0 = vld [vmem:[%s5182_s0] ss:$0 sm:$0xff]  ;;  %s4181_s11 = smov 112   ;;  %s4182_s12 = smov 120   ;;  %v3664_v3 = vld [vmem:[%s5182_s0 + $0x1] ss:$0 sm:$0xff] }
   0x2   :  { %478 = vrot.lane.b32.xlu1 %v3695_v0, %s4179_s29  ;;  %158 = vrot.lane.b32.xlu0 %v3695_v0, %s4180_s30  ;;  %v29_v1 = vld [vmem:[%s5182_s0] sm:$0x1]  ;;  %s4183_s13 = smov 104   ;;  %s4184_s14 = smov 108   ;;  %v30_v4 = vld [vmem:[%s5182_s0 + $0x1] sm:$0x1] }
   0x3   :  { %46 = vst.msk [vmem:[#allocation2] sm:$0x1] %vm45_vm0, %v29_v1  ;;  %s4185_s15 = smov 96   ;;  %s4186_s16 = smov 100   ;;  %v2494_v2 = vld [vmem:[%s5183_s1] sm:$0xf] }
   0x4   :  { %s4187_s17 = smov 88   ;;  %s4188_s18 = smov 92   ;;  %4031 = vmatprep.subr.msk.mxu0 %vm2592_vm1, %v2494_v2  ;;  %47 = vst.msk [vmem:[#allocation2 + $0x10] sm:$0x1] %vm45_vm0, %v30_v4  ;;  %v3681_v5 = vld [vmem:[%s5182_s0 + $0x2] ss:$0 sm:$0xff] }
   0x5   :  { %s4189_s19 = smov 80   ;;  %s4190_s20 = smov 84   ;;  %4032 = vmatpush3.msk.msra.mxu0 %vm2592_vm1, %v2494_v2  ;;  %v31_v6 = vld [vmem:[%s5182_s0 + $0x2] sm:$0x1]  ;;  %v3666_v7 = vld [vmem:[%s5182_s0 + $0x3] ss:$0 sm:$0xff] }
   0x6   :  { %638 = vrot.lane.b32.xlu1 %v3695_v0, %s4181_s11  ;;  %318 = vrot.lane.b32.xlu0 %v3695_v0, %s4182_s12  ;;  %s4191_s23 = smov 72   ;;  %s4192_s24 = smov 76   ;;  %48 = vst.msk [vmem:[#allocation2 + $0x20] sm:$0x1] %vm45_vm0, %v31_v6  ;;  %v32_v8 = vld [vmem:[%s5182_s0 + $0x3] sm:$0x1] }
   0x7   :  { %s4193_s1 = smov 68   ;;  %49 = vst.msk [vmem:[#allocation2 + $0x30] sm:$0x1] %vm45_vm0, %v32_v8  ;;  %v3683_v11 = vld [vmem:[%s5182_s0 + $0x4] ss:$0 sm:$0xff] }
   0x8   :  { %v33_v14 = vld [vmem:[%s5182_s0 + $0x4] sm:$0x1]  ;;  %v3668_v28 = vld [vmem:[%s5182_s0 + $0x5] ss:$0 sm:$0xff]  ;;  %v3685_v48 = vld [vmem:[%s5182_s0 + $0x6] ss:$0 sm:$0xff] }
   0x9   :  { %50 = vst.msk [vmem:[#allocation2 + $0x40] sm:$0x1] %vm45_vm0, %v33_v14  ;;  %v34_v31 = vld [vmem:[%s5182_s0 + $0x5] sm:$0x1]  ;;  %v35_v52 = vld [vmem:[%s5182_s0 + $0x6] sm:$0x1] }
   0xa   :  { %958 = vrot.lane.b32.xlu1 %v3695_v0, %s4183_s13  ;;  %798 = vrot.lane.b32.xlu0 %v3695_v0, %s4184_s14  ;;  %51 = vst.msk [vmem:[#allocation2 + $0x50] sm:$0x1] %vm45_vm0, %v34_v31  ;;  %52 = vst.msk [vmem:[#allocation2 + $0x60] sm:$0x1] %vm45_vm0, %v35_v52  ;;  %v3670_v2 = vld [vmem:[%s5182_s0 + $0x7] ss:$0 sm:$0xff] }
   0xe   :  { %1278 = vrot.lane.b32.xlu1 %v3695_v0, %s4185_s15  ;;  %1118 = vrot.lane.b32.xlu0 %v3695_v0, %s4186_s16 }
  0x12   :  { %1598 = vrot.lane.b32.xlu1 %v3695_v0, %s4187_s17  ;;  %1438 = vrot.lane.b32.xlu0 %v3695_v0, %s4188_s18 }
  0x16   :  { %1918 = vrot.lane.b32.xlu1 %v3695_v0, %s4189_s19  ;;  %1758 = vrot.lane.b32.xlu0 %v3695_v0, %s4190_s20 }
  0x1a   :  { %2238 = vrot.lane.b32.xlu1 %v3695_v0, %s4191_s23  ;;  %2078 = vrot.lane.b32.xlu0 %v3695_v0, %s4192_s24 }
  0x1e   :  { %160 = vrot.lane.b32.xlu1 %v3664_v3, %s4180_s30  ;;  %2398 = vrot.lane.b32.xlu0 %v3695_v0, %s4193_s1 }
  0x22   :  { %480 = vrot.lane.b32.xlu1 %v3664_v3, %s4179_s29  ;;  %320 = vrot.lane.b32.xlu0 %v3664_v3, %s4182_s12 }
  0x26   :  { %800 = vrot.lane.b32.xlu1 %v3664_v3, %s4184_s14  ;;  %640 = vrot.lane.b32.xlu0 %v3664_v3, %s4181_s11 }
  0x2a   :  { %1120 = vrot.lane.b32.xlu1 %v3664_v3, %s4186_s16  ;;  %960 = vrot.lane.b32.xlu0 %v3664_v3, %s4183_s13 }
  0x2e   :  { %1440 = vrot.lane.b32.xlu1 %v3664_v3, %s4188_s18  ;;  %1280 = vrot.lane.b32.xlu0 %v3664_v3, %s4185_s15 }
  0x32   :  { %1760 = vrot.lane.b32.xlu1 %v3664_v3, %s4190_s20  ;;  %1600 = vrot.lane.b32.xlu0 %v3664_v3, %s4187_s17 }
  0x36   :  { %2080 = vrot.lane.b32.xlu1 %v3664_v3, %s4192_s24  ;;  %1920 = vrot.lane.b32.xlu0 %v3664_v3, %s4189_s19 }
  0x3a   :  { %2400 = vrot.lane.b32.xlu1 %v3664_v3, %s4193_s1  ;;  %2240 = vrot.lane.b32.xlu0 %v3664_v3, %s4191_s23 }
  0x3e   :  { %322 = vrot.lane.b32.xlu1 %v3681_v5, %s4182_s12  ;;  %162 = vrot.lane.b32.xlu0 %v3681_v5, %s4180_s30 }
  0x42   :  { %642 = vrot.lane.b32.xlu1 %v3681_v5, %s4181_s11  ;;  %482 = vrot.lane.b32.xlu0 %v3681_v5, %s4179_s29 }
  0x46   :  { %962 = vrot.lane.b32.xlu1 %v3681_v5, %s4183_s13  ;;  %802 = vrot.lane.b32.xlu0 %v3681_v5, %s4184_s14 }
  0x4a   :  { %1282 = vrot.lane.b32.xlu1 %v3681_v5, %s4185_s15  ;;  %1122 = vrot.lane.b32.xlu0 %v3681_v5, %s4186_s16 }
  0x4e   :  { %1602 = vrot.lane.b32.xlu1 %v3681_v5, %s4187_s17  ;;  %1442 = vrot.lane.b32.xlu0 %v3681_v5, %s4188_s18 }
  0x52   :  { %1922 = vrot.lane.b32.xlu1 %v3681_v5, %s4189_s19  ;;  %1762 = vrot.lane.b32.xlu0 %v3681_v5, %s4190_s20 }
  0x56   :  { %2242 = vrot.lane.b32.xlu1 %v3681_v5, %s4191_s23  ;;  %2082 = vrot.lane.b32.xlu0 %v3681_v5, %s4192_s24 }
  0x5a   :  { %164 = vrot.lane.b32.xlu1 %v3666_v7, %s4180_s30  ;;  %2402 = vrot.lane.b32.xlu0 %v3681_v5, %s4193_s1  ;;  %v36_v5 = vld [vmem:[%s5182_s0 + $0x7] sm:$0x1] }
  0x5b   :  { %53 = vst.msk [vmem:[#allocation2 + $0x70] sm:$0x1] %vm45_vm0, %v36_v5 }
  0x5e   :  { %484 = vrot.lane.b32.xlu1 %v3666_v7, %s4179_s29  ;;  %324 = vrot.lane.b32.xlu0 %v3666_v7, %s4182_s12 }
  0x62   :  { %804 = vrot.lane.b32.xlu1 %v3666_v7, %s4184_s14  ;;  %644 = vrot.lane.b32.xlu0 %v3666_v7, %s4181_s11 }
  0x66   :  { %1124 = vrot.lane.b32.xlu1 %v3666_v7, %s4186_s16  ;;  %964 = vrot.lane.b32.xlu0 %v3666_v7, %s4183_s13 }
  0x6a   :  { %1444 = vrot.lane.b32.xlu1 %v3666_v7, %s4188_s18  ;;  %1284 = vrot.lane.b32.xlu0 %v3666_v7, %s4185_s15 }
  0x6e   :  { %1764 = vrot.lane.b32.xlu1 %v3666_v7, %s4190_s20  ;;  %1604 = vrot.lane.b32.xlu0 %v3666_v7, %s4187_s17 }
  0x72   :  { %2084 = vrot.lane.b32.xlu1 %v3666_v7, %s4192_s24  ;;  %1924 = vrot.lane.b32.xlu0 %v3666_v7, %s4189_s19 }
  0x74   :  { %v479_v9 = vpop.permute.xlu1 %478  ;;  %v159_v10 = vpop.permute.xlu0 %158 }
  0x75   :  { %526 = vst.msk [vmem:[#allocation2 + $0x3] sm:$0x1] %vm45_vm0, %v479_v9  ;;  %206 = vst.msk [vmem:[#allocation2 + $0x1] sm:$0x1] %vm45_vm0, %v159_v10 }
  0x76   :  { %2404 = vrot.lane.b32.xlu1 %v3666_v7, %s4193_s1  ;;  %2244 = vrot.lane.b32.xlu0 %v3666_v7, %s4191_s23 }
  0x78   :  { %v639_v12 = vpop.permute.xlu1 %638  ;;  %v319_v13 = vpop.permute.xlu0 %318 }
  0x79   :  { %686 = vst.msk [vmem:[#allocation2 + $0x4] sm:$0x1] %vm45_vm0, %v639_v12  ;;  %366 = vst.msk [vmem:[#allocation2 + $0x2] sm:$0x1] %vm45_vm0, %v319_v13 }
  0x7a   :  { %326 = vrot.lane.b32.xlu1 %v3683_v11, %s4182_s12  ;;  %166 = vrot.lane.b32.xlu0 %v3683_v11, %s4180_s30 }
  0x7c   :  { %v959_v15 = vpop.permute.xlu1 %958  ;;  %v799_v16 = vpop.permute.xlu0 %798 }
  0x7d   :  { %1006 = vst.msk [vmem:[#allocation2 + $0x6] sm:$0x1] %vm45_vm0, %v959_v15  ;;  %846 = vst.msk [vmem:[#allocation2 + $0x5] sm:$0x1] %vm45_vm0, %v799_v16 }
  0x7e   :  { %646 = vrot.lane.b32.xlu1 %v3683_v11, %s4181_s11  ;;  %486 = vrot.lane.b32.xlu0 %v3683_v11, %s4179_s29 }
  0x80   :  { %v1279_v17 = vpop.permute.xlu1 %1278  ;;  %v1119_v18 = vpop.permute.xlu0 %1118 }
  0x81   :  { %1326 = vst.msk [vmem:[#allocation2 + $0x8] sm:$0x1] %vm45_vm0, %v1279_v17  ;;  %1166 = vst.msk [vmem:[#allocation2 + $0x7] sm:$0x1] %vm45_vm0, %v1119_v18 }
  0x82   :  { %966 = vrot.lane.b32.xlu1 %v3683_v11, %s4183_s13  ;;  %806 = vrot.lane.b32.xlu0 %v3683_v11, %s4184_s14 }
  0x84   :  { %v1599_v19 = vpop.permute.xlu1 %1598  ;;  %v1439_v20 = vpop.permute.xlu0 %1438 }
  0x85   :  { %1646 = vst.msk [vmem:[#allocation2 + $0xa] sm:$0x1] %vm45_vm0, %v1599_v19  ;;  %1486 = vst.msk [vmem:[#allocation2 + $0x9] sm:$0x1] %vm45_vm0, %v1439_v20 }
  0x86   :  { %1286 = vrot.lane.b32.xlu1 %v3683_v11, %s4185_s15  ;;  %1126 = vrot.lane.b32.xlu0 %v3683_v11, %s4186_s16 }
  0x88   :  { %v1919_v21 = vpop.permute.xlu1 %1918  ;;  %v1759_v22 = vpop.permute.xlu0 %1758  ;;  %v2462_v23 = vld [vmem:[#allocation2] sm:$0xff] }
  0x89   :  { %1966 = vst.msk [vmem:[#allocation2 + $0xc] sm:$0x1] %vm45_vm0, %v1919_v21  ;;  %1806 = vst.msk [vmem:[#allocation2 + $0xb] sm:$0x1] %vm45_vm0, %v1759_v22  ;;  %4033 = vmatprep.mubr.msk.f32.mxu0 %vm2495_vm2, %v2462_v23  ;;  %v3687_v22 = vld [vmem:[%s5182_s0 + $0x8] ss:$0 sm:$0xff] }
  0x8a   :  { %1606 = vrot.lane.b32.xlu1 %v3683_v11, %s4187_s17  ;;  %1446 = vrot.lane.b32.xlu0 %v3683_v11, %s4188_s18 }
  0x8c   :  { %v2239_v24 = vpop.permute.xlu1 %2238  ;;  %v2079_v25 = vpop.permute.xlu0 %2078 }
  0x8d   :  { %2286 = vst.msk [vmem:[#allocation2 + $0xe] sm:$0x1] %vm45_vm0, %v2239_v24  ;;  %2126 = vst.msk [vmem:[#allocation2 + $0xd] sm:$0x1] %vm45_vm0, %v2079_v25 }
  0x8e   :  { %1926 = vrot.lane.b32.xlu1 %v3683_v11, %s4189_s19  ;;  %1766 = vrot.lane.b32.xlu0 %v3683_v11, %s4190_s20 }
  0x90   :  { %v161_v26 = vpop.permute.xlu1 %160  ;;  %v2399_v27 = vpop.permute.xlu0 %2398 }
  0x91   :  { %207 = vst.msk [vmem:[#allocation2 + $0x11] sm:$0x1] %vm45_vm0, %v161_v26  ;;  %2446 = vst.msk [vmem:[#allocation2 + $0xf] sm:$0x1] %vm45_vm0, %v2399_v27  ;;  %v37_v26 = vld [vmem:[%s5182_s0 + $0x8] sm:$0x1] }
  0x92   :  { %2246 = vrot.lane.b32.xlu1 %v3683_v11, %s4191_s23  ;;  %2086 = vrot.lane.b32.xlu0 %v3683_v11, %s4192_s24  ;;  %54 = vst.msk [vmem:[#allocation2 + $0x80] sm:$0x1] %vm45_vm0, %v37_v26 }
  0x94   :  { %v481_v29 = vpop.permute.xlu1 %480  ;;  %v321_v30 = vpop.permute.xlu0 %320 }
  0x95   :  { %527 = vst.msk [vmem:[#allocation2 + $0x13] sm:$0x1] %vm45_vm0, %v481_v29  ;;  %367 = vst.msk [vmem:[#allocation2 + $0x12] sm:$0x1] %vm45_vm0, %v321_v30 }
  0x96   :  { %168 = vrot.lane.b32.xlu1 %v3668_v28, %s4180_s30  ;;  %2406 = vrot.lane.b32.xlu0 %v3683_v11, %s4193_s1 }
  0x98   :  { %v801_v32 = vpop.permute.xlu1 %800  ;;  %v641_v33 = vpop.permute.xlu0 %640  ;;  %v2463_v34 = vld [vmem:[#allocation2 + $0x8] sm:$0xff] }
  0x99   :  { %847 = vst.msk [vmem:[#allocation2 + $0x15] sm:$0x1] %vm45_vm0, %v801_v32  ;;  %687 = vst.msk [vmem:[#allocation2 + $0x14] sm:$0x1] %vm45_vm0, %v641_v33  ;;  %4034 = vmatmul.mubr.msk.f32.vlgmr.msra.gmra.mrb[0].mxu0 %vm2495_vm2, %v2463_v34 }
  0x9a   :  { %488 = vrot.lane.b32.xlu1 %v3668_v28, %s4179_s29  ;;  %328 = vrot.lane.b32.xlu0 %v3668_v28, %s4182_s12 }
  0x9c   :  { %v1121_v35 = vpop.permute.xlu1 %1120  ;;  %v961_v36 = vpop.permute.xlu0 %960 }
  0x9d   :  { %1167 = vst.msk [vmem:[#allocation2 + $0x17] sm:$0x1] %vm45_vm0, %v1121_v35  ;;  %1007 = vst.msk [vmem:[#allocation2 + $0x16] sm:$0x1] %vm45_vm0, %v961_v36 }
  0x9e   :  { %808 = vrot.lane.b32.xlu1 %v3668_v28, %s4184_s14  ;;  %648 = vrot.lane.b32.xlu0 %v3668_v28, %s4181_s11 }
  0xa0   :  { %v1441_v37 = vpop.permute.xlu1 %1440  ;;  %v1281_v38 = vpop.permute.xlu0 %1280 }
  0xa1   :  { %1487 = vst.msk [vmem:[#allocation2 + $0x19] sm:$0x1] %vm45_vm0, %v1441_v37  ;;  %1327 = vst.msk [vmem:[#allocation2 + $0x18] sm:$0x1] %vm45_vm0, %v1281_v38 }
  0xa2   :  { %1128 = vrot.lane.b32.xlu1 %v3668_v28, %s4186_s16  ;;  %968 = vrot.lane.b32.xlu0 %v3668_v28, %s4183_s13 }
  0xa4   :  { %v1761_v39 = vpop.permute.xlu1 %1760  ;;  %v1601_v40 = vpop.permute.xlu0 %1600  ;;  %v2464_v41 = vld [vmem:[#allocation2 + $0x10] sm:$0xff] }
  0xa5   :  { %1807 = vst.msk [vmem:[#allocation2 + $0x1b] sm:$0x1] %vm45_vm0, %v1761_v39  ;;  %1647 = vst.msk [vmem:[#allocation2 + $0x1a] sm:$0x1] %vm45_vm0, %v1601_v40  ;;  %4036 = vmatprep.mubr.msk.f32.mxu0 %vm2495_vm2, %v2464_v41  ;;  %v3672_v40 = vld [vmem:[%s5182_s0 + $0x9] ss:$0 sm:$0xff] }
  0xa6   :  { %1448 = vrot.lane.b32.xlu1 %v3668_v28, %s4188_s18  ;;  %1288 = vrot.lane.b32.xlu0 %v3668_v28, %s4185_s15 }
  0xa8   :  { %v2081_v42 = vpop.permute.xlu1 %2080  ;;  %v1921_v43 = vpop.permute.xlu0 %1920 }
  0xa9   :  { %2127 = vst.msk [vmem:[#allocation2 + $0x1d] sm:$0x1] %vm45_vm0, %v2081_v42  ;;  %1967 = vst.msk [vmem:[#allocation2 + $0x1c] sm:$0x1] %vm45_vm0, %v1921_v43  ;;  %v38_v43 = vld [vmem:[%s5182_s0 + $0x9] sm:$0x1] }
  0xaa   :  { %1768 = vrot.lane.b32.xlu1 %v3668_v28, %s4190_s20  ;;  %1608 = vrot.lane.b32.xlu0 %v3668_v28, %s4187_s17  ;;  %55 = vst.msk [vmem:[#allocation2 + $0x90] sm:$0x1] %vm45_vm0, %v38_v43 }
  0xac   :  { %v2401_v44 = vpop.permute.xlu1 %2400  ;;  %v2241_v45 = vpop.permute.xlu0 %2240 }
  0xad   :  { %2447 = vst.msk [vmem:[#allocation2 + $0x1f] sm:$0x1] %vm45_vm0, %v2401_v44  ;;  %2287 = vst.msk [vmem:[#allocation2 + $0x1e] sm:$0x1] %vm45_vm0, %v2241_v45 }
  0xae   :  { %2088 = vrot.lane.b32.xlu1 %v3668_v28, %s4192_s24  ;;  %1928 = vrot.lane.b32.xlu0 %v3668_v28, %s4189_s19 }
  0xb0   :  { %v323_v46 = vpop.permute.xlu1 %322  ;;  %v163_v47 = vpop.permute.xlu0 %162 }
  0xb1   :  { %368 = vst.msk [vmem:[#allocation2 + $0x22] sm:$0x1] %vm45_vm0, %v323_v46  ;;  %208 = vst.msk [vmem:[#allocation2 + $0x21] sm:$0x1] %vm45_vm0, %v163_v47 }
  0xb2   :  { %2408 = vrot.lane.b32.xlu1 %v3668_v28, %s4193_s1  ;;  %2248 = vrot.lane.b32.xlu0 %v3668_v28, %s4191_s23 }
  0xb4   :  { %v643_v49 = vpop.permute.xlu1 %642  ;;  %v483_v50 = vpop.permute.xlu0 %482  ;;  %v2465_v51 = vld [vmem:[#allocation2 + $0x18] sm:$0xff] }
  0xb5   :  { %688 = vst.msk [vmem:[#allocation2 + $0x24] sm:$0x1] %vm45_vm0, %v643_v49  ;;  %528 = vst.msk [vmem:[#allocation2 + $0x23] sm:$0x1] %vm45_vm0, %v483_v50  ;;  %4037 = vmatmul.mubr.msk.f32.gmra.mrb[2].mxu0 %vm2495_vm2, %v2465_v51 }
  0xb6   :  { %330 = vrot.lane.b32.xlu1 %v3685_v48, %s4182_s12  ;;  %170 = vrot.lane.b32.xlu0 %v3685_v48, %s4180_s30 }
  0xb8   :  { %v963_v53 = vpop.permute.xlu1 %962  ;;  %v803_v54 = vpop.permute.xlu0 %802 }
  0xb9   :  { %1008 = vst.msk [vmem:[#allocation2 + $0x26] sm:$0x1] %vm45_vm0, %v963_v53  ;;  %848 = vst.msk [vmem:[#allocation2 + $0x25] sm:$0x1] %vm45_vm0, %v803_v54 }
  0xba   :  { %650 = vrot.lane.b32.xlu1 %v3685_v48, %s4181_s11  ;;  %490 = vrot.lane.b32.xlu0 %v3685_v48, %s4179_s29 }
  0xbc   :  { %v1283_v55 = vpop.permute.xlu1 %1282  ;;  %v1123_v56 = vpop.permute.xlu0 %1122 }
  0xbd   :  { %1328 = vst.msk [vmem:[#allocation2 + $0x28] sm:$0x1] %vm45_vm0, %v1283_v55  ;;  %1168 = vst.msk [vmem:[#allocation2 + $0x27] sm:$0x1] %vm45_vm0, %v1123_v56 }
  0xbe   :  { %970 = vrot.lane.b32.xlu1 %v3685_v48, %s4183_s13  ;;  %810 = vrot.lane.b32.xlu0 %v3685_v48, %s4184_s14 }
  0xc0   :  { %v1603_v57 = vpop.permute.xlu1 %1602  ;;  %v1443_v58 = vpop.permute.xlu0 %1442 }
  0xc1   :  { %1648 = vst.msk [vmem:[#allocation2 + $0x2a] sm:$0x1] %vm45_vm0, %v1603_v57  ;;  %1488 = vst.msk [vmem:[#allocation2 + $0x29] sm:$0x1] %vm45_vm0, %v1443_v58 }
  0xc2   :  { %1290 = vrot.lane.b32.xlu1 %v3685_v48, %s4185_s15  ;;  %1130 = vrot.lane.b32.xlu0 %v3685_v48, %s4186_s16 }
  0xc4   :  { %v1923_v59 = vpop.permute.xlu1 %1922  ;;  %v1763_v60 = vpop.permute.xlu0 %1762  ;;  %v2466_v61 = vld [vmem:[#allocation2 + $0x20] sm:$0xff] }
  0xc5   :  { %1968 = vst.msk [vmem:[#allocation2 + $0x2c] sm:$0x1] %vm45_vm0, %v1923_v59  ;;  %1808 = vst.msk [vmem:[#allocation2 + $0x2b] sm:$0x1] %vm45_vm0, %v1763_v60  ;;  %4039 = vmatprep.mubr.msk.f32.mxu0 %vm2495_vm2, %v2466_v61  ;;  %v3689_v60 = vld [vmem:[%s5182_s0 + $0xa] ss:$0 sm:$0xff] }
  0xc6   :  { %1610 = vrot.lane.b32.xlu1 %v3685_v48, %s4187_s17  ;;  %1450 = vrot.lane.b32.xlu0 %v3685_v48, %s4188_s18 }
  0xc8   :  { %v2243_v62 = vpop.permute.xlu1 %2242  ;;  %v2083_v63 = vpop.permute.xlu0 %2082 }
  0xc9   :  { %2288 = vst.msk [vmem:[#allocation2 + $0x2e] sm:$0x1] %vm45_vm0, %v2243_v62  ;;  %2128 = vst.msk [vmem:[#allocation2 + $0x2d] sm:$0x1] %vm45_vm0, %v2083_v63 }
  0xca   :  { %1930 = vrot.lane.b32.xlu1 %v3685_v48, %s4189_s19  ;;  %1770 = vrot.lane.b32.xlu0 %v3685_v48, %s4190_s20 }
  0xcc   :  { %v165_v0 = vpop.permute.xlu1 %164  ;;  %v2403_v1 = vpop.permute.xlu0 %2402 }
  0xcd   :  { %209 = vst.msk [vmem:[#allocation2 + $0x31] sm:$0x1] %vm45_vm0, %v165_v0  ;;  %2448 = vst.msk [vmem:[#allocation2 + $0x2f] sm:$0x1] %vm45_vm0, %v2403_v1  ;;  %v39_v0 = vld [vmem:[%s5182_s0 + $0xa] sm:$0x1] }
  0xce   :  { %2250 = vrot.lane.b32.xlu1 %v3685_v48, %s4191_s23  ;;  %2090 = vrot.lane.b32.xlu0 %v3685_v48, %s4192_s24  ;;  %56 = vst.msk [vmem:[#allocation2 + $0xa0] sm:$0x1] %vm45_vm0, %v39_v0 }
  0xd0   :  { %v485_v3 = vpop.permute.xlu1 %484  ;;  %v325_v4 = vpop.permute.xlu0 %324 }
  0xd1   :  { %529 = vst.msk [vmem:[#allocation2 + $0x33] sm:$0x1] %vm45_vm0, %v485_v3  ;;  %369 = vst.msk [vmem:[#allocation2 + $0x32] sm:$0x1] %vm45_vm0, %v325_v4 }
  0xd2   :  { %172 = vrot.lane.b32.xlu1 %v3670_v2, %s4180_s30  ;;  %2410 = vrot.lane.b32.xlu0 %v3685_v48, %s4193_s1 }
  0xd4   :  { %v805_v6 = vpop.permute.xlu1 %804  ;;  %v645_v7 = vpop.permute.xlu0 %644  ;;  %v2467_v8 = vld [vmem:[#allocation2 + $0x28] sm:$0xff] }
  0xd5   :  { %849 = vst.msk [vmem:[#allocation2 + $0x35] sm:$0x1] %vm45_vm0, %v805_v6  ;;  %689 = vst.msk [vmem:[#allocation2 + $0x34] sm:$0x1] %vm45_vm0, %v645_v7  ;;  %4040 = vmatmul.mubr.msk.f32.gmra.mrb[4].mxu0 %vm2495_vm2, %v2467_v8 }
  0xd6   :  { %492 = vrot.lane.b32.xlu1 %v3670_v2, %s4179_s29  ;;  %332 = vrot.lane.b32.xlu0 %v3670_v2, %s4182_s12 }
  0xd8   :  { %v1125_v9 = vpop.permute.xlu1 %1124  ;;  %v965_v10 = vpop.permute.xlu0 %964 }
  0xd9   :  { %1169 = vst.msk [vmem:[#allocation2 + $0x37] sm:$0x1] %vm45_vm0, %v1125_v9  ;;  %1009 = vst.msk [vmem:[#allocation2 + $0x36] sm:$0x1] %vm45_vm0, %v965_v10 }
  0xda   :  { %812 = vrot.lane.b32.xlu1 %v3670_v2, %s4184_s14  ;;  %652 = vrot.lane.b32.xlu0 %v3670_v2, %s4181_s11 }
  0xdc   :  { %v1445_v11 = vpop.permute.xlu1 %1444  ;;  %v1285_v12 = vpop.permute.xlu0 %1284 }
  0xdd   :  { %1489 = vst.msk [vmem:[#allocation2 + $0x39] sm:$0x1] %vm45_vm0, %v1445_v11  ;;  %1329 = vst.msk [vmem:[#allocation2 + $0x38] sm:$0x1] %vm45_vm0, %v1285_v12 }
  0xde   :  { %1132 = vrot.lane.b32.xlu1 %v3670_v2, %s4186_s16  ;;  %972 = vrot.lane.b32.xlu0 %v3670_v2, %s4183_s13 }
  0xe0   :  { %v1765_v13 = vpop.permute.xlu1 %1764  ;;  %v1605_v14 = vpop.permute.xlu0 %1604  ;;  %v2468_v15 = vld [vmem:[#allocation2 + $0x30] sm:$0xff] }
  0xe1   :  { %1809 = vst.msk [vmem:[#allocation2 + $0x3b] sm:$0x1] %vm45_vm0, %v1765_v13  ;;  %1649 = vst.msk [vmem:[#allocation2 + $0x3a] sm:$0x1] %vm45_vm0, %v1605_v14  ;;  %4042 = vmatprep.mubr.msk.f32.mxu0 %vm2495_vm2, %v2468_v15  ;;  %v3674_v14 = vld [vmem:[%s5182_s0 + $0xb] ss:$0 sm:$0xff] }
  0xe2   :  { %1452 = vrot.lane.b32.xlu1 %v3670_v2, %s4188_s18  ;;  %1292 = vrot.lane.b32.xlu0 %v3670_v2, %s4185_s15 }
  0xe4   :  { %v2085_v16 = vpop.permute.xlu1 %2084  ;;  %v1925_v17 = vpop.permute.xlu0 %1924 }
  0xe5   :  { %2129 = vst.msk [vmem:[#allocation2 + $0x3d] sm:$0x1] %vm45_vm0, %v2085_v16  ;;  %1969 = vst.msk [vmem:[#allocation2 + $0x3c] sm:$0x1] %vm45_vm0, %v1925_v17  ;;  %v40_v17 = vld [vmem:[%s5182_s0 + $0xb] sm:$0x1] }
  0xe6   :  { %1772 = vrot.lane.b32.xlu1 %v3670_v2, %s4190_s20  ;;  %1612 = vrot.lane.b32.xlu0 %v3670_v2, %s4187_s17  ;;  %57 = vst.msk [vmem:[#allocation2 + $0xb0] sm:$0x1] %vm45_vm0, %v40_v17  ;;  %v4194_v17 = vmov 0.0  }
  0xe8   :  { %v2405_v18 = vpop.permute.xlu1 %2404  ;;  %v2245_v19 = vpop.permute.xlu0 %2244 }
  0xe9   :  { %2449 = vst.msk [vmem:[#allocation2 + $0x3f] sm:$0x1] %vm45_vm0, %v2405_v18  ;;  %2289 = vst.msk [vmem:[#allocation2 + $0x3e] sm:$0x1] %vm45_vm0, %v2245_v19 }
  0xea   :  { %2092 = vrot.lane.b32.xlu1 %v3670_v2, %s4192_s24  ;;  %1932 = vrot.lane.b32.xlu0 %v3670_v2, %s4189_s19 }
  0xec   :  { %v327_v20 = vpop.permute.xlu1 %326  ;;  %v167_v21 = vpop.permute.xlu0 %166 }
  0xed   :  { %370 = vst.msk [vmem:[#allocation2 + $0x42] sm:$0x1] %vm45_vm0, %v327_v20  ;;  %210 = vst.msk [vmem:[#allocation2 + $0x41] sm:$0x1] %vm45_vm0, %v167_v21 }
  0xee   :  { %2412 = vrot.lane.b32.xlu1 %v3670_v2, %s4193_s1  ;;  %2252 = vrot.lane.b32.xlu0 %v3670_v2, %s4191_s23 }
  0xf0   :  { %v647_v23 = vpop.permute.xlu1 %646  ;;  %v487_v24 = vpop.permute.xlu0 %486  ;;  %v2469_v25 = vld [vmem:[#allocation2 + $0x38] sm:$0xff] }
  0xf1   :  { %690 = vst.msk [vmem:[#allocation2 + $0x44] sm:$0x1] %vm45_vm0, %v647_v23  ;;  %530 = vst.msk [vmem:[#allocation2 + $0x43] sm:$0x1] %vm45_vm0, %v487_v24  ;;  %4043 = vmatmul.mubr.msk.f32.gmra.mrb[6].mxu0 %vm2495_vm2, %v2469_v25 }
  0xf2   :  { %334 = vrot.lane.b32.xlu1 %v3687_v22, %s4182_s12  ;;  %174 = vrot.lane.b32.xlu0 %v3687_v22, %s4180_s30 }
  0xf4   :  { %v967_v27 = vpop.permute.xlu1 %966  ;;  %v807_v28 = vpop.permute.xlu0 %806 }
  0xf5   :  { %1010 = vst.msk [vmem:[#allocation2 + $0x46] sm:$0x1] %vm45_vm0, %v967_v27  ;;  %850 = vst.msk [vmem:[#allocation2 + $0x45] sm:$0x1] %vm45_vm0, %v807_v28 }
  0xf6   :  { %654 = vrot.lane.b32.xlu1 %v3687_v22, %s4181_s11  ;;  %494 = vrot.lane.b32.xlu0 %v3687_v22, %s4179_s29 }
  0xf8   :  { %v1287_v29 = vpop.permute.xlu1 %1286  ;;  %v1127_v30 = vpop.permute.xlu0 %1126 }
  0xf9   :  { %1330 = vst.msk [vmem:[#allocation2 + $0x48] sm:$0x1] %vm45_vm0, %v1287_v29  ;;  %1170 = vst.msk [vmem:[#allocation2 + $0x47] sm:$0x1] %vm45_vm0, %v1127_v30 }
  0xfa   :  { %974 = vrot.lane.b32.xlu1 %v3687_v22, %s4183_s13  ;;  %814 = vrot.lane.b32.xlu0 %v3687_v22, %s4184_s14 }
  0xfc   :  { %v1607_v31 = vpop.permute.xlu1 %1606  ;;  %v1447_v32 = vpop.permute.xlu0 %1446 }
  0xfd   :  { %1650 = vst.msk [vmem:[#allocation2 + $0x4a] sm:$0x1] %vm45_vm0, %v1607_v31  ;;  %1490 = vst.msk [vmem:[#allocation2 + $0x49] sm:$0x1] %vm45_vm0, %v1447_v32 }
  0xfe   :  { %1294 = vrot.lane.b32.xlu1 %v3687_v22, %s4185_s15  ;;  %1134 = vrot.lane.b32.xlu0 %v3687_v22, %s4186_s16 }
 0x100   :  { %v1927_v33 = vpop.permute.xlu1 %1926  ;;  %v1767_v34 = vpop.permute.xlu0 %1766  ;;  %v2470_v35 = vld [vmem:[#allocation2 + $0x40] sm:$0xff] }
 0x101   :  { %1970 = vst.msk [vmem:[#allocation2 + $0x4c] sm:$0x1] %vm45_vm0, %v1927_v33  ;;  %1810 = vst.msk [vmem:[#allocation2 + $0x4b] sm:$0x1] %vm45_vm0, %v1767_v34  ;;  %4045 = vmatprep.mubr.msk.f32.mxu0 %vm2495_vm2, %v2470_v35  ;;  %v4650_v34 = vld [vmem:[%s5182_s0 + $0xc] ss:$0 sm:$0xff] }
 0x102   :  { %1614 = vrot.lane.b32.xlu1 %v3687_v22, %s4187_s17  ;;  %1454 = vrot.lane.b32.xlu0 %v3687_v22, %s4188_s18 }
 0x104   :  { %v2247_v36 = vpop.permute.xlu1 %2246  ;;  %v2087_v37 = vpop.permute.xlu0 %2086 }
 0x105   :  { %2290 = vst.msk [vmem:[#allocation2 + $0x4e] sm:$0x1] %vm45_vm0, %v2247_v36  ;;  %2130 = vst.msk [vmem:[#allocation2 + $0x4d] sm:$0x1] %vm45_vm0, %v2087_v37 }
 0x106   :  { %1934 = vrot.lane.b32.xlu1 %v3687_v22, %s4189_s19  ;;  %1774 = vrot.lane.b32.xlu0 %v3687_v22, %s4190_s20 }
 0x108   :  { %v169_v38 = vpop.permute.xlu1 %168  ;;  %v2407_v39 = vpop.permute.xlu0 %2406 }
 0x109   :  { %211 = vst.msk [vmem:[#allocation2 + $0x51] sm:$0x1] %vm45_vm0, %v169_v38  ;;  %2450 = vst.msk [vmem:[#allocation2 + $0x4f] sm:$0x1] %vm45_vm0, %v2407_v39  ;;  %v41_v38 = vld [vmem:[%s5182_s0 + $0xc] sm:$0x1] }
 0x10a   :  { %2254 = vrot.lane.b32.xlu1 %v3687_v22, %s4191_s23  ;;  %2094 = vrot.lane.b32.xlu0 %v3687_v22, %s4192_s24  ;;  %58 = vst.msk [vmem:[#allocation2 + $0xc0] sm:$0x1] %vm45_vm0, %v41_v38  ;;  %v43_v38 = vld [vmem:[%s5182_s0 + $0xe] sm:$0x1] }
 0x10b   :  { %60 = vst.msk [vmem:[#allocation2 + $0xe0] sm:$0x1] %vm45_vm0, %v43_v38 }
 0x10c   :  { %v489_v41 = vpop.permute.xlu1 %488  ;;  %v329_v42 = vpop.permute.xlu0 %328 }
 0x10d   :  { %531 = vst.msk [vmem:[#allocation2 + $0x53] sm:$0x1] %vm45_vm0, %v489_v41  ;;  %371 = vst.msk [vmem:[#allocation2 + $0x52] sm:$0x1] %vm45_vm0, %v329_v42 }
 0x10e   :  { %176 = vrot.lane.b32.xlu1 %v3672_v40, %s4180_s30  ;;  %2414 = vrot.lane.b32.xlu0 %v3687_v22, %s4193_s1 }
 0x110   :  { %v809_v44 = vpop.permute.xlu1 %808  ;;  %v649_v45 = vpop.permute.xlu0 %648  ;;  %v2471_v46 = vld [vmem:[#allocation2 + $0x48] sm:$0xff] }
 0x111   :  { %851 = vst.msk [vmem:[#allocation2 + $0x55] sm:$0x1] %vm45_vm0, %v809_v44  ;;  %691 = vst.msk [vmem:[#allocation2 + $0x54] sm:$0x1] %vm45_vm0, %v649_v45  ;;  %4046 = vmatmul.mubr.msk.f32.gmra.mrb[8].mxu0 %vm2495_vm2, %v2471_v46 }
 0x112   :  { %496 = vrot.lane.b32.xlu1 %v3672_v40, %s4179_s29  ;;  %336 = vrot.lane.b32.xlu0 %v3672_v40, %s4182_s12 }
 0x114   :  { %v1129_v47 = vpop.permute.xlu1 %1128  ;;  %v969_v48 = vpop.permute.xlu0 %968 }
 0x115   :  { %1171 = vst.msk [vmem:[#allocation2 + $0x57] sm:$0x1] %vm45_vm0, %v1129_v47  ;;  %1011 = vst.msk [vmem:[#allocation2 + $0x56] sm:$0x1] %vm45_vm0, %v969_v48 }
 0x116   :  { %816 = vrot.lane.b32.xlu1 %v3672_v40, %s4184_s14  ;;  %656 = vrot.lane.b32.xlu0 %v3672_v40, %s4181_s11 }
 0x118   :  { %v1449_v49 = vpop.permute.xlu1 %1448  ;;  %v1289_v50 = vpop.permute.xlu0 %1288 }
 0x119   :  { %1491 = vst.msk [vmem:[#allocation2 + $0x59] sm:$0x1] %vm45_vm0, %v1449_v49  ;;  %1331 = vst.msk [vmem:[#allocation2 + $0x58] sm:$0x1] %vm45_vm0, %v1289_v50 }
 0x11a   :  { %1136 = vrot.lane.b32.xlu1 %v3672_v40, %s4186_s16  ;;  %976 = vrot.lane.b32.xlu0 %v3672_v40, %s4183_s13 }
 0x11c   :  { %v1769_v51 = vpop.permute.xlu1 %1768  ;;  %v1609_v52 = vpop.permute.xlu0 %1608  ;;  %v2472_v53 = vld [vmem:[#allocation2 + $0x50] sm:$0xff] }
 0x11d   :  { %1811 = vst.msk [vmem:[#allocation2 + $0x5b] sm:$0x1] %vm45_vm0, %v1769_v51  ;;  %1651 = vst.msk [vmem:[#allocation2 + $0x5a] sm:$0x1] %vm45_vm0, %v1609_v52  ;;  %4048 = vmatprep.mubr.msk.f32.mxu0 %vm2495_vm2, %v2472_v53  ;;  %v3936_v52 = vld [vmem:[%s5184_s2] ss:$0 sm:$0xff] }
 0x11e   :  { %1456 = vrot.lane.b32.xlu1 %v3672_v40, %s4188_s18  ;;  %1296 = vrot.lane.b32.xlu0 %v3672_v40, %s4185_s15  ;;  %v2823_v53 = vld [vmem:[%s5185_s3 + $0x8] sm:$0xff] }
 0x120   :  { %v2089_v54 = vpop.permute.xlu1 %2088  ;;  %v1929_v55 = vpop.permute.xlu0 %1928 }
 0x121   :  { %2131 = vst.msk [vmem:[#allocation2 + $0x5d] sm:$0x1] %vm45_vm0, %v2089_v54  ;;  %1971 = vst.msk [vmem:[#allocation2 + $0x5c] sm:$0x1] %vm45_vm0, %v1929_v55  ;;  %v2822_v54 = vld [vmem:[%s5185_s3] sm:$0xff] }
 0x122   :  { %1776 = vrot.lane.b32.xlu1 %v3672_v40, %s4190_s20  ;;  %1616 = vrot.lane.b32.xlu0 %v3672_v40, %s4187_s17 }
 0x124   :  { %v2409_v56 = vpop.permute.xlu1 %2408  ;;  %v2249_v57 = vpop.permute.xlu0 %2248 }
 0x125   :  { %2451 = vst.msk [vmem:[#allocation2 + $0x5f] sm:$0x1] %vm45_vm0, %v2409_v56  ;;  %2291 = vst.msk [vmem:[#allocation2 + $0x5e] sm:$0x1] %vm45_vm0, %v2249_v57  ;;  %v4705_v57 = vadd.f32 %v3936_v52, %v2823_v53 }
 0x126   :  { %2096 = vrot.lane.b32.xlu1 %v3672_v40, %s4192_s24  ;;  %1936 = vrot.lane.b32.xlu0 %v3672_v40, %s4189_s19 }
 0x128   :  { %v331_v58 = vpop.permute.xlu1 %330  ;;  %v171_v59 = vpop.permute.xlu0 %170 }
 0x129   :  { %372 = vst.msk [vmem:[#allocation2 + $0x62] sm:$0x1] %vm45_vm0, %v331_v58  ;;  %212 = vst.msk [vmem:[#allocation2 + $0x61] sm:$0x1] %vm45_vm0, %v171_v59  ;;  %v4711_v58 = vadd.f32 %v3936_v52, %v2822_v54  ;;  %v4716_v59 = vld [vmem:[%s5182_s0 + $0xd] ss:$0 sm:$0xff] }
 0x12a   :  { %2416 = vrot.lane.b32.xlu1 %v3672_v40, %s4193_s1  ;;  %2256 = vrot.lane.b32.xlu0 %v3672_v40, %s4191_s23 }
 0x12c   :  { %v651_v61 = vpop.permute.xlu1 %650  ;;  %v491_v62 = vpop.permute.xlu0 %490  ;;  %v2473_v63 = vld [vmem:[#allocation2 + $0x58] sm:$0xff] }
 0x12d   :  { %692 = vst.msk [vmem:[#allocation2 + $0x64] sm:$0x1] %vm45_vm0, %v651_v61  ;;  %532 = vst.msk [vmem:[#allocation2 + $0x63] sm:$0x1] %vm45_vm0, %v491_v62  ;;  %4049 = vmatmul.mubr.msk.f32.gmra.mrb[10].mxu0 %vm2495_vm2, %v2473_v63  ;;  %v42_v62 = vld [vmem:[%s5182_s0 + $0xd] sm:$0x1] }
 0x12e   :  { %338 = vrot.lane.b32.xlu1 %v3689_v60, %s4182_s12  ;;  %178 = vrot.lane.b32.xlu0 %v3689_v60, %s4180_s30  ;;  %59 = vst.msk [vmem:[#allocation2 + $0xd0] sm:$0x1] %vm45_vm0, %v42_v62 }
 0x130   :  { %v971_v1 = vpop.permute.xlu1 %970  ;;  %v811_v2 = vpop.permute.xlu0 %810 }
 0x131   :  { %1012 = vst.msk [vmem:[#allocation2 + $0x66] sm:$0x1] %vm45_vm0, %v971_v1  ;;  %852 = vst.msk [vmem:[#allocation2 + $0x65] sm:$0x1] %vm45_vm0, %v811_v2 }
 0x132   :  { %658 = vrot.lane.b32.xlu1 %v3689_v60, %s4181_s11  ;;  %498 = vrot.lane.b32.xlu0 %v3689_v60, %s4179_s29 }
 0x134   :  { %v1291_v3 = vpop.permute.xlu1 %1290  ;;  %v1131_v4 = vpop.permute.xlu0 %1130 }
 0x135   :  { %1332 = vst.msk [vmem:[#allocation2 + $0x68] sm:$0x1] %vm45_vm0, %v1291_v3  ;;  %1172 = vst.msk [vmem:[#allocation2 + $0x67] sm:$0x1] %vm45_vm0, %v1131_v4 }
 0x136   :  { %978 = vrot.lane.b32.xlu1 %v3689_v60, %s4183_s13  ;;  %818 = vrot.lane.b32.xlu0 %v3689_v60, %s4184_s14 }
 0x138   :  { %v1611_v5 = vpop.permute.xlu1 %1610  ;;  %v1451_v6 = vpop.permute.xlu0 %1450 }
 0x139   :  { %1652 = vst.msk [vmem:[#allocation2 + $0x6a] sm:$0x1] %vm45_vm0, %v1611_v5  ;;  %1492 = vst.msk [vmem:[#allocation2 + $0x69] sm:$0x1] %vm45_vm0, %v1451_v6 }
 0x13a   :  { %1298 = vrot.lane.b32.xlu1 %v3689_v60, %s4185_s15  ;;  %1138 = vrot.lane.b32.xlu0 %v3689_v60, %s4186_s16 }
 0x13c   :  { %v1931_v7 = vpop.permute.xlu1 %1930  ;;  %v1771_v8 = vpop.permute.xlu0 %1770  ;;  %v2474_v9 = vld [vmem:[#allocation2 + $0x60] sm:$0xff] }
 0x13d   :  { %1972 = vst.msk [vmem:[#allocation2 + $0x6c] sm:$0x1] %vm45_vm0, %v1931_v7  ;;  %1812 = vst.msk [vmem:[#allocation2 + $0x6b] sm:$0x1] %vm45_vm0, %v1771_v8  ;;  %4051 = vmatprep.mubr.msk.f32.mxu0 %vm2495_vm2, %v2474_v9 }
 0x13e   :  { %1618 = vrot.lane.b32.xlu1 %v3689_v60, %s4187_s17  ;;  %1458 = vrot.lane.b32.xlu0 %v3689_v60, %s4188_s18 }
 0x140   :  { %v2251_v10 = vpop.permute.xlu1 %2250  ;;  %v2091_v11 = vpop.permute.xlu0 %2090 }
 0x141   :  { %2292 = vst.msk [vmem:[#allocation2 + $0x6e] sm:$0x1] %vm45_vm0, %v2251_v10  ;;  %2132 = vst.msk [vmem:[#allocation2 + $0x6d] sm:$0x1] %vm45_vm0, %v2091_v11 }
 0x142   :  { %1938 = vrot.lane.b32.xlu1 %v3689_v60, %s4189_s19  ;;  %1778 = vrot.lane.b32.xlu0 %v3689_v60, %s4190_s20 }
 0x144   :  { %v173_v12 = vpop.permute.xlu1 %172  ;;  %v2411_v13 = vpop.permute.xlu0 %2410 }
 0x145   :  { %213 = vst.msk [vmem:[#allocation2 + $0x71] sm:$0x1] %vm45_vm0, %v173_v12  ;;  %2452 = vst.msk [vmem:[#allocation2 + $0x6f] sm:$0x1] %vm45_vm0, %v2411_v13 }
 0x146   :  { %2258 = vrot.lane.b32.xlu1 %v3689_v60, %s4191_s23  ;;  %2098 = vrot.lane.b32.xlu0 %v3689_v60, %s4192_s24 }
 0x148   :  { %v493_v15 = vpop.permute.xlu1 %492  ;;  %v333_v16 = vpop.permute.xlu0 %332 }
 0x149   :  { %533 = vst.msk [vmem:[#allocation2 + $0x73] sm:$0x1] %vm45_vm0, %v493_v15  ;;  %373 = vst.msk [vmem:[#allocation2 + $0x72] sm:$0x1] %vm45_vm0, %v333_v16 }
 0x14a   :  { %180 = vrot.lane.b32.xlu1 %v3674_v14, %s4180_s30  ;;  %2418 = vrot.lane.b32.xlu0 %v3689_v60, %s4193_s1 }
 0x14c   :  { %v813_v18 = vpop.permute.xlu1 %812  ;;  %v653_v19 = vpop.permute.xlu0 %652  ;;  %v2475_v20 = vld [vmem:[#allocation2 + $0x68] sm:$0xff] }
 0x14d   :  { %853 = vst.msk [vmem:[#allocation2 + $0x75] sm:$0x1] %vm45_vm0, %v813_v18  ;;  %693 = vst.msk [vmem:[#allocation2 + $0x74] sm:$0x1] %vm45_vm0, %v653_v19  ;;  %4052 = vmatmul.mubr.msk.f32.gmra.mrb[12].mxu0 %vm2495_vm2, %v2475_v20 }
 0x14e   :  { %500 = vrot.lane.b32.xlu1 %v3674_v14, %s4179_s29  ;;  %340 = vrot.lane.b32.xlu0 %v3674_v14, %s4182_s12 }
 0x150   :  { %v1133_v21 = vpop.permute.xlu1 %1132  ;;  %v973_v22 = vpop.permute.xlu0 %972 }
 0x151   :  { %1173 = vst.msk [vmem:[#allocation2 + $0x77] sm:$0x1] %vm45_vm0, %v1133_v21  ;;  %1013 = vst.msk [vmem:[#allocation2 + $0x76] sm:$0x1] %vm45_vm0, %v973_v22 }
 0x152   :  { %820 = vrot.lane.b32.xlu1 %v3674_v14, %s4184_s14  ;;  %660 = vrot.lane.b32.xlu0 %v3674_v14, %s4181_s11 }
 0x154   :  { %v1453_v23 = vpop.permute.xlu1 %1452  ;;  %v1293_v24 = vpop.permute.xlu0 %1292 }
 0x155   :  { %1493 = vst.msk [vmem:[#allocation2 + $0x79] sm:$0x1] %vm45_vm0, %v1453_v23  ;;  %1333 = vst.msk [vmem:[#allocation2 + $0x78] sm:$0x1] %vm45_vm0, %v1293_v24 }
 0x156   :  { %1140 = vrot.lane.b32.xlu1 %v3674_v14, %s4186_s16  ;;  %980 = vrot.lane.b32.xlu0 %v3674_v14, %s4183_s13 }
 0x158   :  { %v1773_v25 = vpop.permute.xlu1 %1772  ;;  %v1613_v26 = vpop.permute.xlu0 %1612  ;;  %v2476_v27 = vld [vmem:[#allocation2 + $0x70] sm:$0xff] }
 0x159   :  { %1813 = vst.msk [vmem:[#allocation2 + $0x7b] sm:$0x1] %vm45_vm0, %v1773_v25  ;;  %1653 = vst.msk [vmem:[#allocation2 + $0x7a] sm:$0x1] %vm45_vm0, %v1613_v26  ;;  %4054 = vmatprep.mubr.msk.f32.mxu0 %vm2495_vm2, %v2476_v27 }
 0x15a   :  { %1460 = vrot.lane.b32.xlu1 %v3674_v14, %s4188_s18  ;;  %1300 = vrot.lane.b32.xlu0 %v3674_v14, %s4185_s15 }
 0x15c   :  { %v2093_v28 = vpop.permute.xlu1 %2092  ;;  %v1933_v29 = vpop.permute.xlu0 %1932 }
 0x15d   :  { %2133 = vst.msk [vmem:[#allocation2 + $0x7d] sm:$0x1] %vm45_vm0, %v2093_v28  ;;  %1973 = vst.msk [vmem:[#allocation2 + $0x7c] sm:$0x1] %vm45_vm0, %v1933_v29 }
 0x15e   :  { %1780 = vrot.lane.b32.xlu1 %v3674_v14, %s4190_s20  ;;  %1620 = vrot.lane.b32.xlu0 %v3674_v14, %s4187_s17 }
 0x160   :  { %v2413_v30 = vpop.permute.xlu1 %2412  ;;  %v2253_v31 = vpop.permute.xlu0 %2252 }
 0x161   :  { %2453 = vst.msk [vmem:[#allocation2 + $0x7f] sm:$0x1] %vm45_vm0, %v2413_v30  ;;  %2293 = vst.msk [vmem:[#allocation2 + $0x7e] sm:$0x1] %vm45_vm0, %v2253_v31 }
 0x162   :  { %2100 = vrot.lane.b32.xlu1 %v3674_v14, %s4192_s24  ;;  %1940 = vrot.lane.b32.xlu0 %v3674_v14, %s4189_s19 }
 0x164   :  { %v335_v32 = vpop.permute.xlu1 %334  ;;  %v175_v33 = vpop.permute.xlu0 %174 }
 0x165   :  { %374 = vst.msk [vmem:[#allocation2 + $0x82] sm:$0x1] %vm45_vm0, %v335_v32  ;;  %214 = vst.msk [vmem:[#allocation2 + $0x81] sm:$0x1] %vm45_vm0, %v175_v33 }
 0x166   :  { %2420 = vrot.lane.b32.xlu1 %v3674_v14, %s4193_s1  ;;  %2260 = vrot.lane.b32.xlu0 %v3674_v14, %s4191_s23 }
 0x168   :  { %v655_v35 = vpop.permute.xlu1 %654  ;;  %v495_v36 = vpop.permute.xlu0 %494  ;;  %v2477_v37 = vld [vmem:[#allocation2 + $0x78] sm:$0xff] }
 0x169   :  { %694 = vst.msk [vmem:[#allocation2 + $0x84] sm:$0x1] %vm45_vm0, %v655_v35  ;;  %534 = vst.msk [vmem:[#allocation2 + $0x83] sm:$0x1] %vm45_vm0, %v495_v36  ;;  %4055 = vmatmul.mubr.msk.f32.gmra.mrb[14].mxu0 %vm2495_vm2, %v2477_v37 }
 0x16a   :  { %342 = vrot.lane.b32.xlu1 %v4650_v34, %s4182_s12  ;;  %182 = vrot.lane.b32.xlu0 %v4650_v34, %s4180_s30 }
 0x16c   :  { %v975_v39 = vpop.permute.xlu1 %974  ;;  %v815_v40 = vpop.permute.xlu0 %814 }
 0x16d   :  { %1014 = vst.msk [vmem:[#allocation2 + $0x86] sm:$0x1] %vm45_vm0, %v975_v39  ;;  %854 = vst.msk [vmem:[#allocation2 + $0x85] sm:$0x1] %vm45_vm0, %v815_v40  ;;  %v4035_v41 = vpop.f32.mrb[0].mxu0 }
 0x16e   :  { %v2662_v42 = vpop.f32.mrb[1].mxu0  ;;  %662 = vrot.lane.b32.xlu1 %v4650_v34, %s4181_s11  ;;  %502 = vrot.lane.b32.xlu0 %v4650_v34, %s4179_s29  ;;  %v2833_v63 = vadd.f32 %v4035_v41, %v4705_v57 }
 0x16f   :  { %v2832_v0 = vadd.f32 %v4711_v58, %v2662_v42 }
 0x170   :  { %v1295_v43 = vpop.permute.xlu1 %1294  ;;  %v1135_v44 = vpop.permute.xlu0 %1134  ;;  %v2892_v6 = vmul.f32 0.9, %v2833_v63  ;;  %vm2880_vm3 = vcmp.gt.f32.partialorder %v2833_v63, 1.0  ;;  %v2900_v10 = vmul.f32 0.8, %v2833_v63 }
 0x171   :  { %1334 = vst.msk [vmem:[#allocation2 + $0x88] sm:$0x1] %vm45_vm0, %v1295_v43  ;;  %1174 = vst.msk [vmem:[#allocation2 + $0x87] sm:$0x1] %vm45_vm0, %v1135_v44  ;;  %v2891_v9 = vmul.f32 0.9, %v2832_v0 }
 0x172   :  { %982 = vrot.lane.b32.xlu1 %v4650_v34, %s4183_s13  ;;  %822 = vrot.lane.b32.xlu0 %v4650_v34, %s4184_s14  ;;  %vm2879_vm4 = vcmp.gt.f32.partialorder %v2832_v0, 1.0  ;;  %v2899_v14 = vmul.f32 0.8, %v2832_v0  ;;  %v3938_v18 = vsel %vm2880_vm3, 1.0, %v4194_v17  ;;  %vm3115_vm3 = vcmask 261120  }
 0x173   :  { %v3937_v20 = vsel %vm2879_vm4, 1.0, %v4194_v17 }
 0x174   :  { %v1615_v45 = vpop.permute.xlu1 %1614  ;;  %v1455_v46 = vpop.permute.xlu0 %1454 }
 0x175   :  { %1654 = vst.msk [vmem:[#allocation2 + $0x8a] sm:$0x1] %vm45_vm0, %v1615_v45  ;;  %1494 = vst.msk [vmem:[#allocation2 + $0x89] sm:$0x1] %vm45_vm0, %v1455_v46 }
 0x176   :  { %1302 = vrot.lane.b32.xlu1 %v4650_v34, %s4185_s15  ;;  %1142 = vrot.lane.b32.xlu0 %v4650_v34, %s4186_s16 }
 0x178   :  { %v1935_v47 = vpop.permute.xlu1 %1934  ;;  %v1775_v48 = vpop.permute.xlu0 %1774  ;;  %v2478_v49 = vld [vmem:[#allocation2 + $0x80] sm:$0xff] }
 0x179   :  { %1974 = vst.msk [vmem:[#allocation2 + $0x8c] sm:$0x1] %vm45_vm0, %v1935_v47  ;;  %1814 = vst.msk [vmem:[#allocation2 + $0x8b] sm:$0x1] %vm45_vm0, %v1775_v48  ;;  %4057 = vmatprep.mubr.msk.f32.mxu0 %vm2495_vm2, %v2478_v49 }
 0x17a   :  { %1622 = vrot.lane.b32.xlu1 %v4650_v34, %s4187_s17  ;;  %1462 = vrot.lane.b32.xlu0 %v4650_v34, %s4188_s18 }
 0x17c   :  { %v2255_v50 = vpop.permute.xlu1 %2254  ;;  %v2095_v51 = vpop.permute.xlu0 %2094 }
 0x17d   :  { %2294 = vst.msk [vmem:[#allocation2 + $0x8e] sm:$0x1] %vm45_vm0, %v2255_v50  ;;  %2134 = vst.msk [vmem:[#allocation2 + $0x8d] sm:$0x1] %vm45_vm0, %v2095_v51 }
 0x17e   :  { %1942 = vrot.lane.b32.xlu1 %v4650_v34, %s4189_s19  ;;  %1782 = vrot.lane.b32.xlu0 %v4650_v34, %s4190_s20 }
 0x180   :  { %v177_v55 = vpop.permute.xlu1 %176  ;;  %v2415_v56 = vpop.permute.xlu0 %2414 }
 0x181   :  { %215 = vst.msk [vmem:[#allocation2 + $0x91] sm:$0x1] %vm45_vm0, %v177_v55  ;;  %2454 = vst.msk [vmem:[#allocation2 + $0x8f] sm:$0x1] %vm45_vm0, %v2415_v56 }
 0x182   :  { %2262 = vrot.lane.b32.xlu1 %v4650_v34, %s4191_s23  ;;  %2102 = vrot.lane.b32.xlu0 %v4650_v34, %s4192_s24 }
 0x184   :  { %v497_v60 = vpop.permute.xlu1 %496  ;;  %v337_v61 = vpop.permute.xlu0 %336 }
 0x185   :  { %535 = vst.msk [vmem:[#allocation2 + $0x93] sm:$0x1] %vm45_vm0, %v497_v60  ;;  %375 = vst.msk [vmem:[#allocation2 + $0x92] sm:$0x1] %vm45_vm0, %v337_v61 }
 0x186   :  { %184 = vrot.lane.b32.xlu1 %v4716_v59, %s4180_s30  ;;  %2422 = vrot.lane.b32.xlu0 %v4650_v34, %s4193_s1  ;;  %v4791_v34 = vld [vmem:[%s5182_s0 + $0xe] ss:$0 sm:$0xff] }
 0x188   :  { %v817_v1 = vpop.permute.xlu1 %816  ;;  %v657_v2 = vpop.permute.xlu0 %656  ;;  %v2479_v3 = vld [vmem:[#allocation2 + $0x88] sm:$0xff] }
 0x189   :  { %855 = vst.msk [vmem:[#allocation2 + $0x95] sm:$0x1] %vm45_vm0, %v817_v1  ;;  %695 = vst.msk [vmem:[#allocation2 + $0x94] sm:$0x1] %vm45_vm0, %v657_v2  ;;  %v4038_v4 = vpop.f32.mrb[2].mxu0  ;;  %4058 = vmatmul.mubr.msk.f32.gmra.mrb[16].mxu0 %vm2495_vm2, %v2479_v3 }
 0x18a   :  { %v2835_v5 = vadd.f32 %v4038_v4, %v4705_v57  ;;  %v2672_v7 = vpop.f32.mrb[3].mxu0  ;;  %504 = vrot.lane.b32.xlu1 %v4716_v59, %s4179_s29  ;;  %344 = vrot.lane.b32.xlu0 %v4716_v59, %s4182_s12 }
 0x18b   :  { %v2834_v8 = vadd.f32 %v4711_v58, %v2672_v7 }
 0x18c   :  { %v4739_v11 = vadd.f32 %v2892_v6, %v2835_v5  ;;  %v1137_v12 = vpop.permute.xlu1 %1136  ;;  %v977_v13 = vpop.permute.xlu0 %976  ;;  %v4858_v6 = vld [vmem:[%s5182_s0 + $0xf] ss:$0 sm:$0xff] }
 0x18d   :  { %v4741_v15 = vadd.f32 %v2891_v9, %v2834_v8  ;;  %1175 = vst.msk [vmem:[#allocation2 + $0x97] sm:$0x1] %vm45_vm0, %v1137_v12  ;;  %1015 = vst.msk [vmem:[#allocation2 + $0x96] sm:$0x1] %vm45_vm0, %v977_v13  ;;  %v44_v9 = vld [vmem:[%s5182_s0 + $0xf] sm:$0x1] }
 0x18e   :  { %v2904_v16 = vadd.f32 %v2900_v10, %v4739_v11  ;;  %824 = vrot.lane.b32.xlu1 %v4716_v59, %s4184_s14  ;;  %664 = vrot.lane.b32.xlu0 %v4716_v59, %s4181_s11  ;;  %v2924_v43 = vmul.f32 0.9, %v4739_v11  ;;  %61 = vst.msk [vmem:[#allocation2 + $0xf0] sm:$0x1] %vm45_vm0, %v44_v9  ;;  %s4195_s0 = smov 32  }
 0x18f   :  { %v2903_v19 = vadd.f32 %v2899_v14, %v4741_v15  ;;  %v2923_v46 = vmul.f32 0.9, %v4741_v15 }
 0x190   :  { %v4753_v21 = vsub.f32 %v2904_v16, %v3938_v18  ;;  %v1457_v22 = vpop.permute.xlu1 %1456  ;;  %v1297_v23 = vpop.permute.xlu0 %1296 }
 0x191   :  { %v4755_v24 = vsub.f32 %v2903_v19, %v3937_v20  ;;  %1495 = vst.msk [vmem:[#allocation2 + $0x99] sm:$0x1] %vm45_vm0, %v1457_v22  ;;  %1335 = vst.msk [vmem:[#allocation2 + $0x98] sm:$0x1] %vm45_vm0, %v1297_v23 }
 0x192   :  { %1144 = vrot.lane.b32.xlu1 %v4716_v59, %s4186_s16  ;;  %984 = vrot.lane.b32.xlu0 %v4716_v59, %s4183_s13  ;;  %vm2912_vm5 = vcmp.gt.f32.partialorder %v4753_v21, 1.0  ;;  %v2932_v48 = vmul.f32 0.8, %v4753_v21 }
 0x193   :  { %vm2911_vm6 = vcmp.gt.f32.partialorder %v4755_v24, 1.0  ;;  %v2931_v52 = vmul.f32 0.8, %v4755_v24  ;;  %v3942_v54 = vsel %vm2912_vm5, 1.0, %v4194_v17 }
 0x194   :  { %v1777_v25 = vpop.permute.xlu1 %1776  ;;  %v1617_v26 = vpop.permute.xlu0 %1616  ;;  %v2480_v27 = vld [vmem:[#allocation2 + $0x90] sm:$0xff] }
 0x195   :  { %1815 = vst.msk [vmem:[#allocation2 + $0x9b] sm:$0x1] %vm45_vm0, %v1777_v25  ;;  %1655 = vst.msk [vmem:[#allocation2 + $0x9a] sm:$0x1] %vm45_vm0, %v1617_v26  ;;  %4060 = vmatprep.mubr.msk.f32.mxu0 %vm2495_vm2, %v2480_v27 }
 0x196   :  { %1464 = vrot.lane.b32.xlu1 %v4716_v59, %s4188_s18  ;;  %1304 = vrot.lane.b32.xlu0 %v4716_v59, %s4185_s15 }
 0x198   :  { %v2097_v28 = vpop.permute.xlu1 %2096  ;;  %v1937_v29 = vpop.permute.xlu0 %1936 }
 0x199   :  { %2135 = vst.msk [vmem:[#allocation2 + $0x9d] sm:$0x1] %vm45_vm0, %v2097_v28  ;;  %1975 = vst.msk [vmem:[#allocation2 + $0x9c] sm:$0x1] %vm45_vm0, %v1937_v29 }
 0x19a   :  { %1784 = vrot.lane.b32.xlu1 %v4716_v59, %s4190_s20  ;;  %1624 = vrot.lane.b32.xlu0 %v4716_v59, %s4187_s17 }
 0x19c   :  { %v2417_v30 = vpop.permute.xlu1 %2416  ;;  %v2257_v31 = vpop.permute.xlu0 %2256 }
 0x19d   :  { %2455 = vst.msk [vmem:[#allocation2 + $0x9f] sm:$0x1] %vm45_vm0, %v2417_v30  ;;  %2295 = vst.msk [vmem:[#allocation2 + $0x9e] sm:$0x1] %vm45_vm0, %v2257_v31 }
 0x19e   :  { %2104 = vrot.lane.b32.xlu1 %v4716_v59, %s4192_s24  ;;  %1944 = vrot.lane.b32.xlu0 %v4716_v59, %s4189_s19 }
 0x1a0   :  { %v339_v32 = vpop.permute.xlu1 %338  ;;  %v179_v33 = vpop.permute.xlu0 %178 }
 0x1a1   :  { %376 = vst.msk [vmem:[#allocation2 + $0xa2] sm:$0x1] %vm45_vm0, %v339_v32  ;;  %216 = vst.msk [vmem:[#allocation2 + $0xa1] sm:$0x1] %vm45_vm0, %v179_v33 }
 0x1a2   :  { %2424 = vrot.lane.b32.xlu1 %v4716_v59, %s4193_s1  ;;  %2264 = vrot.lane.b32.xlu0 %v4716_v59, %s4191_s23  ;;  %v3941_v59 = vsel %vm2911_vm6, 1.0, %v4194_v17 }
 0x1a4   :  { %v659_v35 = vpop.permute.xlu1 %658  ;;  %v499_v36 = vpop.permute.xlu0 %498  ;;  %v2481_v37 = vld [vmem:[#allocation2 + $0x98] sm:$0xff] }
 0x1a5   :  { %696 = vst.msk [vmem:[#allocation2 + $0xa4] sm:$0x1] %vm45_vm0, %v659_v35  ;;  %536 = vst.msk [vmem:[#allocation2 + $0xa3] sm:$0x1] %vm45_vm0, %v499_v36  ;;  %4061 = vmatmul.mubr.msk.f32.gmra.mrb[18].mxu0 %vm2495_vm2, %v2481_v37 }
 0x1a6   :  { %346 = vrot.lane.b32.xlu1 %v4791_v34, %s4182_s12  ;;  %186 = vrot.lane.b32.xlu0 %v4791_v34, %s4180_s30 }
 0x1a8   :  { %v979_v39 = vpop.permute.xlu1 %978  ;;  %v819_v40 = vpop.permute.xlu0 %818 }
 0x1a9   :  { %1016 = vst.msk [vmem:[#allocation2 + $0xa6] sm:$0x1] %vm45_vm0, %v979_v39  ;;  %856 = vst.msk [vmem:[#allocation2 + $0xa5] sm:$0x1] %vm45_vm0, %v819_v40  ;;  %v4041_v41 = vpop.f32.mrb[4].mxu0 }
 0x1aa   :  { %v2837_v42 = vadd.f32 %v4041_v41, %v4705_v57  ;;  %v2682_v44 = vpop.f32.mrb[5].mxu0  ;;  %666 = vrot.lane.b32.xlu1 %v4791_v34, %s4181_s11  ;;  %506 = vrot.lane.b32.xlu0 %v4791_v34, %s4179_s29 }
 0x1ab   :  { %v2836_v45 = vadd.f32 %v4711_v58, %v2682_v44 }
 0x1ac   :  { %v2928_v47 = vadd.f32 %v2924_v43, %v2837_v42  ;;  %v1299_v49 = vpop.permute.xlu1 %1298  ;;  %v1139_v50 = vpop.permute.xlu0 %1138 }
 0x1ad   :  { %v2927_v51 = vadd.f32 %v2923_v46, %v2836_v45  ;;  %1336 = vst.msk [vmem:[#allocation2 + $0xa8] sm:$0x1] %vm45_vm0, %v1299_v49  ;;  %1176 = vst.msk [vmem:[#allocation2 + $0xa7] sm:$0x1] %vm45_vm0, %v1139_v50 }
 0x1ae   :  { %v2936_v53 = vadd.f32 %v2932_v48, %v2928_v47  ;;  %986 = vrot.lane.b32.xlu1 %v4791_v34, %s4183_s13  ;;  %826 = vrot.lane.b32.xlu0 %v4791_v34, %s4184_s14  ;;  %v2956_v15 = vmul.f32 0.9, %v2928_v47 }
 0x1af   :  { %v2935_v55 = vadd.f32 %v2931_v52, %v2927_v51  ;;  %v2955_v19 = vmul.f32 0.9, %v2927_v51 }
 0x1b0   :  { %v4825_v56 = vsub.f32 %v2936_v53, %v3942_v54  ;;  %v1619_v60 = vpop.permute.xlu1 %1618  ;;  %v1459_v61 = vpop.permute.xlu0 %1458 }
 0x1b1   :  { %v4828_v62 = vsub.f32 %v2935_v55, %v3941_v59  ;;  %1656 = vst.msk [vmem:[#allocation2 + $0xaa] sm:$0x1] %vm45_vm0, %v1619_v60  ;;  %1496 = vst.msk [vmem:[#allocation2 + $0xa9] sm:$0x1] %vm45_vm0, %v1459_v61 }
 0x1b2   :  { %1306 = vrot.lane.b32.xlu1 %v4791_v34, %s4185_s15  ;;  %1146 = vrot.lane.b32.xlu0 %v4791_v34, %s4186_s16  ;;  %vm2944_vm7 = vcmp.gt.f32.partialorder %v4825_v56, 1.0  ;;  %v2964_v21 = vmul.f32 0.8, %v4825_v56 }
 0x1b3   :  { %vm2943_vm8 = vcmp.gt.f32.partialorder %v4828_v62, 1.0  ;;  %v2963_v25 = vmul.f32 0.8, %v4828_v62  ;;  %v3946_v27 = vsel %vm2944_vm7, 1.0, %v4194_v17 }
 0x1b4   :  { %v1939_v63 = vpop.permute.xlu1 %1938  ;;  %v1779_v0 = vpop.permute.xlu0 %1778  ;;  %v2482_v1 = vld [vmem:[#allocation2 + $0xa0] sm:$0xff]  ;;  %v3945_v30 = vsel %vm2943_vm8, 1.0, %v4194_v17 }
 0x1b5   :  { %1976 = vst.msk [vmem:[#allocation2 + $0xac] sm:$0x1] %vm45_vm0, %v1939_v63  ;;  %1816 = vst.msk [vmem:[#allocation2 + $0xab] sm:$0x1] %vm45_vm0, %v1779_v0  ;;  %4063 = vmatprep.mubr.msk.f32.mxu0 %vm2495_vm2, %v2482_v1 }
 0x1b6   :  { %1626 = vrot.lane.b32.xlu1 %v4791_v34, %s4187_s17  ;;  %1466 = vrot.lane.b32.xlu0 %v4791_v34, %s4188_s18 }
 0x1b8   :  { %v2259_v2 = vpop.permute.xlu1 %2258  ;;  %v2099_v3 = vpop.permute.xlu0 %2098 }
 0x1b9   :  { %2296 = vst.msk [vmem:[#allocation2 + $0xae] sm:$0x1] %vm45_vm0, %v2259_v2  ;;  %2136 = vst.msk [vmem:[#allocation2 + $0xad] sm:$0x1] %vm45_vm0, %v2099_v3 }
 0x1ba   :  { %1946 = vrot.lane.b32.xlu1 %v4791_v34, %s4189_s19  ;;  %1786 = vrot.lane.b32.xlu0 %v4791_v34, %s4190_s20 }
 0x1bc   :  { %v181_v4 = vpop.permute.xlu1 %180  ;;  %v2419_v5 = vpop.permute.xlu0 %2418 }
 0x1bd   :  { %217 = vst.msk [vmem:[#allocation2 + $0xb1] sm:$0x1] %vm45_vm0, %v181_v4  ;;  %2456 = vst.msk [vmem:[#allocation2 + $0xaf] sm:$0x1] %vm45_vm0, %v2419_v5 }
 0x1be   :  { %2266 = vrot.lane.b32.xlu1 %v4791_v34, %s4191_s23  ;;  %2106 = vrot.lane.b32.xlu0 %v4791_v34, %s4192_s24 }
 0x1c0   :  { %v501_v7 = vpop.permute.xlu1 %500  ;;  %v341_v8 = vpop.permute.xlu0 %340 }
 0x1c1   :  { %537 = vst.msk [vmem:[#allocation2 + $0xb3] sm:$0x1] %vm45_vm0, %v501_v7  ;;  %377 = vst.msk [vmem:[#allocation2 + $0xb2] sm:$0x1] %vm45_vm0, %v341_v8 }
 0x1c2   :  { %188 = vrot.lane.b32.xlu1 %v4858_v6, %s4180_s30  ;;  %2426 = vrot.lane.b32.xlu0 %v4791_v34, %s4193_s1 }
 0x1c4   :  { %v821_v10 = vpop.permute.xlu1 %820  ;;  %v661_v11 = vpop.permute.xlu0 %660  ;;  %v2483_v12 = vld [vmem:[#allocation2 + $0xa8] sm:$0xff] }
 0x1c5   :  { %857 = vst.msk [vmem:[#allocation2 + $0xb5] sm:$0x1] %vm45_vm0, %v821_v10  ;;  %697 = vst.msk [vmem:[#allocation2 + $0xb4] sm:$0x1] %vm45_vm0, %v661_v11  ;;  %v4044_v13 = vpop.f32.mrb[6].mxu0  ;;  %4064 = vmatmul.mubr.msk.f32.gmra.mrb[20].mxu0 %vm2495_vm2, %v2483_v12 }
 0x1c6   :  { %v2839_v14 = vadd.f32 %v4044_v13, %v4705_v57  ;;  %v2692_v16 = vpop.f32.mrb[7].mxu0  ;;  %508 = vrot.lane.b32.xlu1 %v4858_v6, %s4179_s29  ;;  %348 = vrot.lane.b32.xlu0 %v4858_v6, %s4182_s12 }
 0x1c7   :  { %v2838_v18 = vadd.f32 %v4711_v58, %v2692_v16 }
 0x1c8   :  { %v2960_v20 = vadd.f32 %v2956_v15, %v2839_v14  ;;  %v1141_v22 = vpop.permute.xlu1 %1140  ;;  %v981_v23 = vpop.permute.xlu0 %980 }
 0x1c9   :  { %v2959_v24 = vadd.f32 %v2955_v19, %v2838_v18  ;;  %1177 = vst.msk [vmem:[#allocation2 + $0xb7] sm:$0x1] %vm45_vm0, %v1141_v22  ;;  %1017 = vst.msk [vmem:[#allocation2 + $0xb6] sm:$0x1] %vm45_vm0, %v981_v23 }
 0x1ca   :  { %v2968_v26 = vadd.f32 %v2964_v21, %v2960_v20  ;;  %828 = vrot.lane.b32.xlu1 %v4858_v6, %s4184_s14  ;;  %668 = vrot.lane.b32.xlu0 %v4858_v6, %s4181_s11  ;;  %v2988_v50 = vmul.f32 0.9, %v2960_v20 }
 0x1cb   :  { %v2967_v28 = vadd.f32 %v2963_v25, %v2959_v24  ;;  %v2987_v53 = vmul.f32 0.9, %v2959_v24 }
 0x1cc   :  { %v4890_v29 = vsub.f32 %v2968_v26, %v3946_v27  ;;  %v1461_v31 = vpop.permute.xlu1 %1460  ;;  %v1301_v32 = vpop.permute.xlu0 %1300 }
 0x1cd   :  { %v2971_v33 = vsub.f32 %v2967_v28, %v3945_v30  ;;  %1497 = vst.msk [vmem:[#allocation2 + $0xb9] sm:$0x1] %vm45_vm0, %v1461_v31  ;;  %1337 = vst.msk [vmem:[#allocation2 + $0xb8] sm:$0x1] %vm45_vm0, %v1301_v32 }
 0x1ce   :  { %1148 = vrot.lane.b32.xlu1 %v4858_v6, %s4186_s16  ;;  %988 = vrot.lane.b32.xlu0 %v4858_v6, %s4183_s13  ;;  %vm2976_vm9 = vcmp.gt.f32.partialorder %v4890_v29, 1.0  ;;  %v2996_v55 = vmul.f32 0.8, %v4890_v29 }
 0x1cf   :  { %vm2975_vm10 = vcmp.gt.f32.partialorder %v2971_v33, 1.0  ;;  %v2995_v61 = vmul.f32 0.8, %v2971_v33  ;;  %v3950_v63 = vsel %vm2976_vm9, 1.0, %v4194_v17 }
 0x1d0   :  { %v1781_v34 = vpop.permute.xlu1 %1780  ;;  %v1621_v35 = vpop.permute.xlu0 %1620  ;;  %v2484_v36 = vld [vmem:[#allocation2 + $0xb0] sm:$0xff]  ;;  %v3949_v2 = vsel %vm2975_vm10, 1.0, %v4194_v17 }
 0x1d1   :  { %1817 = vst.msk [vmem:[#allocation2 + $0xbb] sm:$0x1] %vm45_vm0, %v1781_v34  ;;  %1657 = vst.msk [vmem:[#allocation2 + $0xba] sm:$0x1] %vm45_vm0, %v1621_v35  ;;  %4066 = vmatprep.mubr.msk.f32.mxu0 %vm2495_vm2, %v2484_v36 }
 0x1d2   :  { %1468 = vrot.lane.b32.xlu1 %v4858_v6, %s4188_s18  ;;  %1308 = vrot.lane.b32.xlu0 %v4858_v6, %s4185_s15 }
 0x1d4   :  { %v2101_v37 = vpop.permute.xlu1 %2100  ;;  %v1941_v38 = vpop.permute.xlu0 %1940 }
 0x1d5   :  { %2137 = vst.msk [vmem:[#allocation2 + $0xbd] sm:$0x1] %vm45_vm0, %v2101_v37  ;;  %1977 = vst.msk [vmem:[#allocation2 + $0xbc] sm:$0x1] %vm45_vm0, %v1941_v38 }
 0x1d6   :  { %1788 = vrot.lane.b32.xlu1 %v4858_v6, %s4190_s20  ;;  %1628 = vrot.lane.b32.xlu0 %v4858_v6, %s4187_s17  ;;  %s4196_s17 = smov 64  }
 0x1d8   :  { %v2421_v39 = vpop.permute.xlu1 %2420  ;;  %v2261_v40 = vpop.permute.xlu0 %2260 }
 0x1d9   :  { %2457 = vst.msk [vmem:[#allocation2 + $0xbf] sm:$0x1] %vm45_vm0, %v2421_v39  ;;  %2297 = vst.msk [vmem:[#allocation2 + $0xbe] sm:$0x1] %vm45_vm0, %v2261_v40 }
 0x1da   :  { %2108 = vrot.lane.b32.xlu1 %v4858_v6, %s4192_s24  ;;  %1948 = vrot.lane.b32.xlu0 %v4858_v6, %s4189_s19 }
 0x1dc   :  { %v343_v41 = vpop.permute.xlu1 %342  ;;  %v183_v42 = vpop.permute.xlu0 %182 }
 0x1dd   :  { %378 = vst.msk [vmem:[#allocation2 + $0xc2] sm:$0x1] %vm45_vm0, %v343_v41  ;;  %218 = vst.msk [vmem:[#allocation2 + $0xc1] sm:$0x1] %vm45_vm0, %v183_v42 }
 0x1de   :  { %2428 = vrot.lane.b32.xlu1 %v4858_v6, %s4193_s1  ;;  %2268 = vrot.lane.b32.xlu0 %v4858_v6, %s4191_s23 }
 0x1e0   :  { %v663_v43 = vpop.permute.xlu1 %662  ;;  %v503_v44 = vpop.permute.xlu0 %502  ;;  %v2485_v45 = vld [vmem:[#allocation2 + $0xb8] sm:$0xff] }
 0x1e1   :  { %698 = vst.msk [vmem:[#allocation2 + $0xc4] sm:$0x1] %vm45_vm0, %v663_v43  ;;  %538 = vst.msk [vmem:[#allocation2 + $0xc3] sm:$0x1] %vm45_vm0, %v503_v44  ;;  %4067 = vmatmul.mubr.msk.f32.gmra.mrb[22].mxu0 %vm2495_vm2, %v2485_v45 }
 0x1e4   :  { %v983_v46 = vpop.permute.xlu1 %982  ;;  %v823_v47 = vpop.permute.xlu0 %822 }
 0x1e5   :  { %1018 = vst.msk [vmem:[#allocation2 + $0xc6] sm:$0x1] %vm45_vm0, %v983_v46  ;;  %858 = vst.msk [vmem:[#allocation2 + $0xc5] sm:$0x1] %vm45_vm0, %v823_v47  ;;  %v4047_v48 = vpop.f32.mrb[8].mxu0 }
 0x1e6   :  { %v2841_v49 = vadd.f32 %v4047_v48, %v4705_v57  ;;  %v2702_v51 = vpop.f32.mrb[9].mxu0 }
 0x1e7   :  { %v2840_v52 = vadd.f32 %v4711_v58, %v2702_v51 }
 0x1e8   :  { %v2992_v54 = vadd.f32 %v2988_v50, %v2841_v49  ;;  %v1303_v56 = vpop.permute.xlu1 %1302  ;;  %v1143_v59 = vpop.permute.xlu0 %1142 }
 0x1e9   :  { %v2991_v60 = vadd.f32 %v2987_v53, %v2840_v52  ;;  %1338 = vst.msk [vmem:[#allocation2 + $0xc8] sm:$0x1] %vm45_vm0, %v1303_v56  ;;  %1178 = vst.msk [vmem:[#allocation2 + $0xc7] sm:$0x1] %vm45_vm0, %v1143_v59 }
 0x1ea   :  { %v3000_v62 = vadd.f32 %v2996_v55, %v2992_v54  ;;  %v3020_v21 = vmul.f32 0.9, %v2992_v54 }
 0x1eb   :  { %v2999_v0 = vadd.f32 %v2995_v61, %v2991_v60  ;;  %v3019_v24 = vmul.f32 0.9, %v2991_v60 }
 0x1ec   :  { %v3004_v1 = vsub.f32 %v3000_v62, %v3950_v63  ;;  %v1623_v3 = vpop.permute.xlu1 %1622  ;;  %v1463_v4 = vpop.permute.xlu0 %1462 }
 0x1ed   :  { %v3003_v5 = vsub.f32 %v2999_v0, %v3949_v2  ;;  %1658 = vst.msk [vmem:[#allocation2 + $0xca] sm:$0x1] %vm45_vm0, %v1623_v3  ;;  %1498 = vst.msk [vmem:[#allocation2 + $0xc9] sm:$0x1] %vm45_vm0, %v1463_v4 }
 0x1ee   :  { %vm3008_vm11 = vcmp.gt.f32.partialorder %v3004_v1, 1.0  ;;  %v3028_v26 = vmul.f32 0.8, %v3004_v1 }
 0x1ef   :  { %vm3007_vm12 = vcmp.gt.f32.partialorder %v3003_v5, 1.0  ;;  %v3027_v30 = vmul.f32 0.8, %v3003_v5  ;;  %v3954_v32 = vsel %vm3008_vm11, 1.0, %v4194_v17 }
 0x1f0   :  { %v1943_v6 = vpop.permute.xlu1 %1942  ;;  %v1783_v7 = vpop.permute.xlu0 %1782  ;;  %v2486_v8 = vld [vmem:[#allocation2 + $0xc0] sm:$0xff]  ;;  %v3953_v35 = vsel %vm3007_vm12, 1.0, %v4194_v17 }
 0x1f1   :  { %1978 = vst.msk [vmem:[#allocation2 + $0xcc] sm:$0x1] %vm45_vm0, %v1943_v6  ;;  %1818 = vst.msk [vmem:[#allocation2 + $0xcb] sm:$0x1] %vm45_vm0, %v1783_v7  ;;  %4069 = vmatprep.mubr.msk.f32.mxu0 %vm2495_vm2, %v2486_v8 }
 0x1f4   :  { %v2263_v9 = vpop.permute.xlu1 %2262  ;;  %v2103_v10 = vpop.permute.xlu0 %2102 }
 0x1f5   :  { %2298 = vst.msk [vmem:[#allocation2 + $0xce] sm:$0x1] %vm45_vm0, %v2263_v9  ;;  %2138 = vst.msk [vmem:[#allocation2 + $0xcd] sm:$0x1] %vm45_vm0, %v2103_v10 }
 0x1f8   :  { %v185_v11 = vpop.permute.xlu1 %184  ;;  %v2423_v12 = vpop.permute.xlu0 %2422 }
 0x1f9   :  { %219 = vst.msk [vmem:[#allocation2 + $0xd1] sm:$0x1] %vm45_vm0, %v185_v11  ;;  %2458 = vst.msk [vmem:[#allocation2 + $0xcf] sm:$0x1] %vm45_vm0, %v2423_v12 }
 0x1fc   :  { %v505_v13 = vpop.permute.xlu1 %504  ;;  %v345_v14 = vpop.permute.xlu0 %344 }
 0x1fd   :  { %539 = vst.msk [vmem:[#allocation2 + $0xd3] sm:$0x1] %vm45_vm0, %v505_v13  ;;  %379 = vst.msk [vmem:[#allocation2 + $0xd2] sm:$0x1] %vm45_vm0, %v345_v14 }
 0x200   :  { %v825_v15 = vpop.permute.xlu1 %824  ;;  %v665_v16 = vpop.permute.xlu0 %664  ;;  %v2487_v18 = vld [vmem:[#allocation2 + $0xc8] sm:$0xff] }
 0x201   :  { %859 = vst.msk [vmem:[#allocation2 + $0xd5] sm:$0x1] %vm45_vm0, %v825_v15  ;;  %699 = vst.msk [vmem:[#allocation2 + $0xd4] sm:$0x1] %vm45_vm0, %v665_v16  ;;  %v4050_v19 = vpop.f32.mrb[10].mxu0  ;;  %4070 = vmatmul.mubr.msk.f32.gmra.mrb[24].mxu0 %vm2495_vm2, %v2487_v18 }
 0x202   :  { %v2843_v20 = vadd.f32 %v4050_v19, %v4705_v57  ;;  %v2712_v22 = vpop.f32.mrb[11].mxu0 }
 0x203   :  { %v2842_v23 = vadd.f32 %v4711_v58, %v2712_v22 }
 0x204   :  { %v3024_v25 = vadd.f32 %v3020_v21, %v2843_v20  ;;  %v1145_v27 = vpop.permute.xlu1 %1144  ;;  %v985_v28 = vpop.permute.xlu0 %984 }
 0x205   :  { %v3023_v29 = vadd.f32 %v3019_v24, %v2842_v23  ;;  %1179 = vst.msk [vmem:[#allocation2 + $0xd7] sm:$0x1] %vm45_vm0, %v1145_v27  ;;  %1019 = vst.msk [vmem:[#allocation2 + $0xd6] sm:$0x1] %vm45_vm0, %v985_v28 }
 0x206   :  { %v3032_v31 = vadd.f32 %v3028_v26, %v3024_v25  ;;  %v3052_v55 = vmul.f32 0.9, %v3024_v25 }
 0x207   :  { %v3031_v33 = vadd.f32 %v3027_v30, %v3023_v29  ;;  %v3051_v60 = vmul.f32 0.9, %v3023_v29 }
 0x208   :  { %v3036_v34 = vsub.f32 %v3032_v31, %v3954_v32  ;;  %v1465_v36 = vpop.permute.xlu1 %1464  ;;  %v1305_v37 = vpop.permute.xlu0 %1304 }
 0x209   :  { %v3035_v38 = vsub.f32 %v3031_v33, %v3953_v35  ;;  %1499 = vst.msk [vmem:[#allocation2 + $0xd9] sm:$0x1] %vm45_vm0, %v1465_v36  ;;  %1339 = vst.msk [vmem:[#allocation2 + $0xd8] sm:$0x1] %vm45_vm0, %v1305_v37 }
 0x20a   :  { %vm3040_vm13 = vcmp.gt.f32.partialorder %v3036_v34, 1.0  ;;  %v3060_v62 = vmul.f32 0.8, %v3036_v34 }
 0x20b   :  { %vm3039_vm14 = vcmp.gt.f32.partialorder %v3035_v38, 1.0  ;;  %v3059_v2 = vmul.f32 0.8, %v3035_v38  ;;  %v3958_v4 = vsel %vm3040_vm13, 1.0, %v4194_v17 }
 0x20c   :  { %v1785_v39 = vpop.permute.xlu1 %1784  ;;  %v1625_v40 = vpop.permute.xlu0 %1624  ;;  %v2488_v41 = vld [vmem:[#allocation2 + $0xd0] sm:$0xff]  ;;  %v3957_v7 = vsel %vm3039_vm14, 1.0, %v4194_v17 }
 0x20d   :  { %1819 = vst.msk [vmem:[#allocation2 + $0xdb] sm:$0x1] %vm45_vm0, %v1785_v39  ;;  %1659 = vst.msk [vmem:[#allocation2 + $0xda] sm:$0x1] %vm45_vm0, %v1625_v40  ;;  %4072 = vmatprep.mubr.msk.f32.mxu0 %vm2495_vm2, %v2488_v41 }
 0x210   :  { %v2105_v42 = vpop.permute.xlu1 %2104  ;;  %v1945_v43 = vpop.permute.xlu0 %1944 }
 0x211   :  { %2139 = vst.msk [vmem:[#allocation2 + $0xdd] sm:$0x1] %vm45_vm0, %v2105_v42  ;;  %1979 = vst.msk [vmem:[#allocation2 + $0xdc] sm:$0x1] %vm45_vm0, %v1945_v43 }
 0x214   :  { %v2425_v44 = vpop.permute.xlu1 %2424  ;;  %v2265_v45 = vpop.permute.xlu0 %2264 }
 0x215   :  { %2459 = vst.msk [vmem:[#allocation2 + $0xdf] sm:$0x1] %vm45_vm0, %v2425_v44  ;;  %2299 = vst.msk [vmem:[#allocation2 + $0xde] sm:$0x1] %vm45_vm0, %v2265_v45 }
 0x218   :  { %v347_v46 = vpop.permute.xlu1 %346  ;;  %v187_v47 = vpop.permute.xlu0 %186 }
 0x219   :  { %380 = vst.msk [vmem:[#allocation2 + $0xe2] sm:$0x1] %vm45_vm0, %v347_v46  ;;  %220 = vst.msk [vmem:[#allocation2 + $0xe1] sm:$0x1] %vm45_vm0, %v187_v47 }
 0x21c   :  { %v667_v48 = vpop.permute.xlu1 %666  ;;  %v507_v49 = vpop.permute.xlu0 %506  ;;  %v2489_v50 = vld [vmem:[#allocation2 + $0xd8] sm:$0xff] }
 0x21d   :  { %700 = vst.msk [vmem:[#allocation2 + $0xe4] sm:$0x1] %vm45_vm0, %v667_v48  ;;  %540 = vst.msk [vmem:[#allocation2 + $0xe3] sm:$0x1] %vm45_vm0, %v507_v49  ;;  %4073 = vmatmul.mubr.msk.f32.gmra.mrb[26].mxu0 %vm2495_vm2, %v2489_v50 }
 0x220   :  { %v987_v51 = vpop.permute.xlu1 %986  ;;  %v827_v52 = vpop.permute.xlu0 %826 }
 0x221   :  { %1020 = vst.msk [vmem:[#allocation2 + $0xe6] sm:$0x1] %vm45_vm0, %v987_v51  ;;  %860 = vst.msk [vmem:[#allocation2 + $0xe5] sm:$0x1] %vm45_vm0, %v827_v52  ;;  %v4053_v53 = vpop.f32.mrb[12].mxu0 }
 0x222   :  { %v2845_v54 = vadd.f32 %v4053_v53, %v4705_v57  ;;  %v2722_v56 = vpop.f32.mrb[13].mxu0 }
 0x223   :  { %v2844_v59 = vadd.f32 %v4711_v58, %v2722_v56 }
 0x224   :  { %v3056_v61 = vadd.f32 %v3052_v55, %v2845_v54  ;;  %v1307_v63 = vpop.permute.xlu1 %1306  ;;  %v1147_v0 = vpop.permute.xlu0 %1146 }
 0x225   :  { %v3055_v1 = vadd.f32 %v3051_v60, %v2844_v59  ;;  %1340 = vst.msk [vmem:[#allocation2 + $0xe8] sm:$0x1] %vm45_vm0, %v1307_v63  ;;  %1180 = vst.msk [vmem:[#allocation2 + $0xe7] sm:$0x1] %vm45_vm0, %v1147_v0 }
 0x226   :  { %v3064_v3 = vadd.f32 %v3060_v62, %v3056_v61  ;;  %v3084_v26 = vmul.f32 0.9, %v3056_v61 }
 0x227   :  { %v3063_v5 = vadd.f32 %v3059_v2, %v3055_v1  ;;  %v3083_v29 = vmul.f32 0.9, %v3055_v1 }
 0x228   :  { %v3068_v6 = vsub.f32 %v3064_v3, %v3958_v4  ;;  %v1627_v8 = vpop.permute.xlu1 %1626  ;;  %v1467_v9 = vpop.permute.xlu0 %1466 }
 0x229   :  { %v3067_v10 = vsub.f32 %v3063_v5, %v3957_v7  ;;  %1660 = vst.msk [vmem:[#allocation2 + $0xea] sm:$0x1] %vm45_vm0, %v1627_v8  ;;  %1500 = vst.msk [vmem:[#allocation2 + $0xe9] sm:$0x1] %vm45_vm0, %v1467_v9 }
 0x22a   :  { %vm3072_vm15 = vcmp.gt.f32.partialorder %v3068_v6, 1.0  ;;  %v3092_v31 = vmul.f32 0.8, %v3068_v6 }
 0x22b   :  { %vm3071_vm1 = vcmp.gt.f32.partialorder %v3067_v10, 1.0  ;;  %v3091_v35 = vmul.f32 0.8, %v3067_v10  ;;  %v3962_v37 = vsel %vm3072_vm15, 1.0, %v4194_v17 }
 0x22c   :  { %v1947_v11 = vpop.permute.xlu1 %1946  ;;  %v1787_v12 = vpop.permute.xlu0 %1786  ;;  %v2490_v13 = vld [vmem:[#allocation2 + $0xe0] sm:$0xff]  ;;  %v3961_v40 = vsel %vm3071_vm1, 1.0, %v4194_v17 }
 0x22d   :  { %1980 = vst.msk [vmem:[#allocation2 + $0xec] sm:$0x1] %vm45_vm0, %v1947_v11  ;;  %1820 = vst.msk [vmem:[#allocation2 + $0xeb] sm:$0x1] %vm45_vm0, %v1787_v12  ;;  %4075 = vmatprep.mubr.msk.f32.mxu0 %vm2495_vm2, %v2490_v13 }
 0x230   :  { %v2267_v14 = vpop.permute.xlu1 %2266  ;;  %v2107_v15 = vpop.permute.xlu0 %2106 }
 0x231   :  { %2300 = vst.msk [vmem:[#allocation2 + $0xee] sm:$0x1] %vm45_vm0, %v2267_v14  ;;  %2140 = vst.msk [vmem:[#allocation2 + $0xed] sm:$0x1] %vm45_vm0, %v2107_v15 }
 0x234   :  { %v189_v16 = vpop.permute.xlu1 %188  ;;  %v2427_v18 = vpop.permute.xlu0 %2426 }
 0x235   :  { %221 = vst.msk [vmem:[#allocation2 + $0xf1] sm:$0x1] %vm45_vm0, %v189_v16  ;;  %2460 = vst.msk [vmem:[#allocation2 + $0xef] sm:$0x1] %vm45_vm0, %v2427_v18 }
 0x238   :  { %v509_v19 = vpop.permute.xlu1 %508  ;;  %v349_v20 = vpop.permute.xlu0 %348 }
 0x239   :  { %541 = vst.msk [vmem:[#allocation2 + $0xf3] sm:$0x1] %vm45_vm0, %v509_v19  ;;  %381 = vst.msk [vmem:[#allocation2 + $0xf2] sm:$0x1] %vm45_vm0, %v349_v20 }
 0x23c   :  { %v829_v21 = vpop.permute.xlu1 %828  ;;  %v669_v22 = vpop.permute.xlu0 %668  ;;  %v2491_v23 = vld [vmem:[#allocation2 + $0xe8] sm:$0xff] }
 0x23d   :  { %861 = vst.msk [vmem:[#allocation2 + $0xf5] sm:$0x1] %vm45_vm0, %v829_v21  ;;  %701 = vst.msk [vmem:[#allocation2 + $0xf4] sm:$0x1] %vm45_vm0, %v669_v22  ;;  %v4056_v24 = vpop.f32.mrb[14].mxu0  ;;  %4076 = vmatmul.mubr.msk.f32.gmra.mrb[28].mxu0 %vm2495_vm2, %v2491_v23 }
 0x23e   :  { %v2847_v25 = vadd.f32 %v4056_v24, %v4705_v57  ;;  %v2732_v27 = vpop.f32.mrb[15].mxu0 }
 0x23f   :  { %v2846_v28 = vadd.f32 %v4711_v58, %v2732_v27 }
 0x240   :  { %v3088_v30 = vadd.f32 %v3084_v26, %v2847_v25  ;;  %v1149_v32 = vpop.permute.xlu1 %1148  ;;  %v989_v33 = vpop.permute.xlu0 %988 }
 0x241   :  { %v3087_v34 = vadd.f32 %v3083_v29, %v2846_v28  ;;  %1181 = vst.msk [vmem:[#allocation2 + $0xf7] sm:$0x1] %vm45_vm0, %v1149_v32  ;;  %1021 = vst.msk [vmem:[#allocation2 + $0xf6] sm:$0x1] %vm45_vm0, %v989_v33 }
 0x242   :  { %v3096_v36 = vadd.f32 %v3092_v31, %v3088_v30 }
 0x243   :  { %v3095_v38 = vadd.f32 %v3091_v35, %v3087_v34 }
 0x244   :  { %v3100_v39 = vsub.f32 %v3096_v36, %v3962_v37  ;;  %v1469_v41 = vpop.permute.xlu1 %1468  ;;  %v1309_v42 = vpop.permute.xlu0 %1308 }
 0x245   :  { %v3099_v43 = vsub.f32 %v3095_v38, %v3961_v40  ;;  %1501 = vst.msk [vmem:[#allocation2 + $0xf9] sm:$0x1] %vm45_vm0, %v1469_v41  ;;  %1341 = vst.msk [vmem:[#allocation2 + $0xf8] sm:$0x1] %vm45_vm0, %v1309_v42 }
 0x246   :  { %vm3104_vm4 = vcmp.gt.f32.partialorder %v3100_v39, 1.0 }
 0x247   :  { %v3966_v44 = vsel %vm3104_vm4, 1.0, %v4194_v17  ;;  %vm3103_vm5 = vcmp.gt.f32.partialorder %v3099_v43, 1.0 }
 0x248   :  { %v3965_v45 = vsel %vm3103_vm5, 1.0, %v4194_v17  ;;  %v1789_v46 = vpop.permute.xlu1 %1788  ;;  %v1629_v47 = vpop.permute.xlu0 %1628  ;;  %v2492_v48 = vld [vmem:[#allocation2 + $0xf0] sm:$0xff]  ;;  %3117 = vst.msk [vmem:[#allocation3 + $0x8] sm:$0xff] %vm3115_vm3, %v3966_v44 }
 0x249   :  { %1821 = vst.msk [vmem:[#allocation2 + $0xfb] sm:$0x1] %vm45_vm0, %v1789_v46  ;;  %1661 = vst.msk [vmem:[#allocation2 + $0xfa] sm:$0x1] %vm45_vm0, %v1629_v47  ;;  %4078 = vmatprep.mubr.msk.f32.mxu0 %vm2495_vm2, %v2492_v48 }
 0x24a   :  { %3116 = vst.msk [vmem:[#allocation3] sm:$0xff] %vm3115_vm3, %v3965_v45 }
 0x24c   :  { %v2109_v49 = vpop.permute.xlu1 %2108  ;;  %v1949_v50 = vpop.permute.xlu0 %1948 }
 0x24d   :  { %2141 = vst.msk [vmem:[#allocation2 + $0xfd] sm:$0x1] %vm45_vm0, %v2109_v49  ;;  %1981 = vst.msk [vmem:[#allocation2 + $0xfc] sm:$0x1] %vm45_vm0, %v1949_v50 }
 0x250   :  { %v2429_v51 = vpop.permute.xlu1 %2428  ;;  %v2269_v52 = vpop.permute.xlu0 %2268 }
 0x251   :  { %2461 = vst.msk [vmem:[#allocation2 + $0xff] sm:$0x1] %vm45_vm0, %v2429_v51  ;;  %2301 = vst.msk [vmem:[#allocation2 + $0xfe] sm:$0x1] %vm45_vm0, %v2269_v52 }
 0x258   :  { %v2493_v53 = vld [vmem:[#allocation2 + $0xf8] sm:$0xff] }
 0x259   :  { %4079 = vmatmul.mubr.msk.f32.gmra.mrb[30].mxu0 %vm2495_vm2, %v2493_v53 }
 0x25c   :  { %v4059_v54 = vpop.f32.mrb[16].mxu0 }
 0x25d   :  { %v2742_v55 = vpop.f32.mrb[17].mxu0  ;;  %v2849_v56 = vadd.f32 %v4059_v54, %v4705_v57 }
 0x25e   :  { %v2848_v59 = vadd.f32 %v4711_v58, %v2742_v55 }
 0x25f   :  { %v2894_v62 = vmul.f32 0.9, %v2849_v56  ;;  %vm2882_vm6 = vcmp.gt.f32.partialorder %v2849_v56, 1.0  ;;  %v2902_v2 = vmul.f32 0.8, %v2849_v56 }
 0x260   :  { %v2893_v1 = vmul.f32 0.9, %v2848_v59  ;;  %vm2881_vm0 = vcmp.gt.f32.partialorder %v2848_v59, 1.0  ;;  %v2901_v4 = vmul.f32 0.8, %v2848_v59  ;;  %v3940_v7 = vsel %vm2882_vm6, 1.0, %v4194_v17 }
 0x261   :  { %v3939_v9 = vsel %vm2881_vm0, 1.0, %v4194_v17  ;;  %vm3135_vm0 = vcmask 130048  }
 0x278   :  { %v4062_v60 = vpop.f32.mrb[18].mxu0 }
 0x279   :  { %v2851_v61 = vadd.f32 %v4062_v60, %v4705_v57  ;;  %v2752_v63 = vpop.f32.mrb[19].mxu0 }
 0x27a   :  { %v2850_v0 = vadd.f32 %v4711_v58, %v2752_v63 }
 0x27b   :  { %v2898_v3 = vadd.f32 %v2894_v62, %v2851_v61 }
 0x27c   :  { %v2897_v5 = vadd.f32 %v2893_v1, %v2850_v0 }
 0x27d   :  { %v2906_v6 = vadd.f32 %v2902_v2, %v2898_v3  ;;  %v2926_v14 = vmul.f32 0.9, %v2898_v3 }
 0x27e   :  { %v2905_v8 = vadd.f32 %v2901_v4, %v2897_v5  ;;  %v2925_v18 = vmul.f32 0.9, %v2897_v5 }
 0x27f   :  { %v2910_v10 = vsub.f32 %v2906_v6, %v3940_v7 }
 0x280   :  { %v2909_v11 = vsub.f32 %v2905_v8, %v3939_v9 }
 0x281   :  { %vm2914_vm2 = vcmp.gt.f32.partialorder %v2910_v10, 1.0  ;;  %v2934_v20 = vmul.f32 0.8, %v2910_v10 }
 0x282   :  { %vm2913_vm7 = vcmp.gt.f32.partialorder %v2909_v11, 1.0  ;;  %v2933_v22 = vmul.f32 0.8, %v2909_v11  ;;  %v3944_v24 = vsel %vm2914_vm2, 1.0, %v4194_v17  ;;  %vm3126_vm2 = vcmask 523520  }
 0x283   :  { %v3943_v27 = vsel %vm2913_vm7, 1.0, %v4194_v17  ;;  %vm3480_vm7 = vcmask 785920  }
 0x298   :  { %v4065_v12 = vpop.f32.mrb[20].mxu0 }
 0x299   :  { %v2853_v13 = vadd.f32 %v4065_v12, %v4705_v57  ;;  %v2762_v15 = vpop.f32.mrb[21].mxu0 }
 0x29a   :  { %v2852_v16 = vadd.f32 %v4711_v58, %v2762_v15 }
 0x29b   :  { %v2930_v19 = vadd.f32 %v2926_v14, %v2853_v13 }
 0x29c   :  { %v2929_v21 = vadd.f32 %v2925_v18, %v2852_v16 }
 0x29d   :  { %v2938_v23 = vadd.f32 %v2934_v20, %v2930_v19  ;;  %v2958_v31 = vmul.f32 0.9, %v2930_v19 }
 0x29e   :  { %v2937_v25 = vadd.f32 %v2933_v22, %v2929_v21  ;;  %v2957_v34 = vmul.f32 0.9, %v2929_v21 }
 0x29f   :  { %v2942_v26 = vsub.f32 %v2938_v23, %v3944_v24 }
 0x2a0   :  { %v2941_v28 = vsub.f32 %v2937_v25, %v3943_v27 }
 0x2a1   :  { %vm2946_vm8 = vcmp.gt.f32.partialorder %v2942_v26, 1.0  ;;  %v2966_v36 = vmul.f32 0.8, %v2942_v26 }
 0x2a2   :  { %vm2945_vm9 = vcmp.gt.f32.partialorder %v2941_v28, 1.0  ;;  %v2965_v38 = vmul.f32 0.8, %v2941_v28  ;;  %v3948_v40 = vsel %vm2946_vm8, 1.0, %v4194_v17  ;;  %vm3499_vm8 = vcmask 1048320  }
 0x2a3   :  { %v3947_v43 = vsel %vm2945_vm9, 1.0, %v4194_v17  ;;  %vm3654_vm9 = vcmask 97280  }
 0x2b4   :  { %v4068_v29 = vpop.f32.mrb[22].mxu0 }
 0x2b5   :  { %v2855_v30 = vadd.f32 %v4068_v29, %v4705_v57  ;;  %v2772_v32 = vpop.f32.mrb[23].mxu0 }
 0x2b6   :  { %v2854_v33 = vadd.f32 %v4711_v58, %v2772_v32 }
 0x2b7   :  { %v2962_v35 = vadd.f32 %v2958_v31, %v2855_v30 }
 0x2b8   :  { %v2961_v37 = vadd.f32 %v2957_v34, %v2854_v33 }
 0x2b9   :  { %v2970_v39 = vadd.f32 %v2966_v36, %v2962_v35  ;;  %v2990_v47 = vmul.f32 0.9, %v2962_v35 }
 0x2ba   :  { %v2969_v41 = vadd.f32 %v2965_v38, %v2961_v37  ;;  %v2989_v50 = vmul.f32 0.9, %v2961_v37 }
 0x2bb   :  { %v2974_v42 = vsub.f32 %v2970_v39, %v3948_v40 }
 0x2bc   :  { %v2973_v44 = vsub.f32 %v2969_v41, %v3947_v43 }
 0x2bd   :  { %vm2978_vm10 = vcmp.gt.f32.partialorder %v2974_v42, 1.0  ;;  %v2998_v52 = vmul.f32 0.8, %v2974_v42 }
 0x2be   :  { %vm2977_vm11 = vcmp.gt.f32.partialorder %v2973_v44, 1.0  ;;  %v2997_v54 = vmul.f32 0.8, %v2973_v44  ;;  %v3952_v56 = vsel %vm2978_vm10, 1.0, %v4194_v17 }
 0x2bf   :  { %v3951_v61 = vsel %vm2977_vm11, 1.0, %v4194_v17 }
 0x2d4   :  { %v4071_v45 = vpop.f32.mrb[24].mxu0 }
 0x2d5   :  { %v2857_v46 = vadd.f32 %v4071_v45, %v4705_v57  ;;  %v2782_v48 = vpop.f32.mrb[25].mxu0 }
 0x2d6   :  { %v2856_v49 = vadd.f32 %v4711_v58, %v2782_v48 }
 0x2d7   :  { %v2994_v51 = vadd.f32 %v2990_v47, %v2857_v46 }
 0x2d8   :  { %v2993_v53 = vadd.f32 %v2989_v50, %v2856_v49  ;;  %v3131_v49 = vld [vmem:[%s5186_s4] sm:$0xff] }
 0x2d9   :  { %v3002_v55 = vadd.f32 %v2998_v52, %v2994_v51  ;;  %v3022_v1 = vmul.f32 0.9, %v2994_v51  ;;  %4085 = vmatprep.mubr.msk.f32.mxu0 %vm3135_vm0, %v3131_v49  ;;  %4092 = vmatprep.mubr.msk.f32.mxu1 %vm3135_vm0, %v3131_v49 }
 0x2da   :  { %v3001_v59 = vadd.f32 %v2997_v54, %v2993_v53  ;;  %v3021_v4 = vmul.f32 0.9, %v2993_v53 }
 0x2db   :  { %v3006_v60 = vsub.f32 %v3002_v55, %v3952_v56  ;;  %v3132_v55 = vld [vmem:[%s5186_s4 + $0x8] sm:$0xff] }
 0x2dc   :  { %v3005_v62 = vsub.f32 %v3001_v59, %v3951_v61 }
 0x2dd   :  { %vm3010_vm12 = vcmp.gt.f32.partialorder %v3006_v60, 1.0  ;;  %v3030_v6 = vmul.f32 0.8, %v3006_v60 }
 0x2de   :  { %vm3009_vm13 = vcmp.gt.f32.partialorder %v3005_v62, 1.0  ;;  %v3029_v8 = vmul.f32 0.8, %v3005_v62  ;;  %v3956_v10 = vsel %vm3010_vm12, 1.0, %v4194_v17  ;;  %v3133_v62 = vld [vmem:[%s5187_s5] sm:$0xff] }
 0x2df   :  { %v3955_v13 = vsel %vm3009_vm13, 1.0, %v4194_v17 }
 0x2f0   :  { %v4074_v63 = vpop.f32.mrb[26].mxu0 }
 0x2f1   :  { %v2859_v0 = vadd.f32 %v4074_v63, %v4705_v57  ;;  %v2792_v2 = vpop.f32.mrb[27].mxu0  ;;  %v3134_v63 = vld [vmem:[%s5187_s5 + $0x8] sm:$0xff] }
 0x2f2   :  { %v2858_v3 = vadd.f32 %v4711_v58, %v2792_v2 }
 0x2f3   :  { %v3026_v5 = vadd.f32 %v3022_v1, %v2859_v0 }
 0x2f4   :  { %v3025_v7 = vadd.f32 %v3021_v4, %v2858_v3 }
 0x2f5   :  { %v3034_v9 = vadd.f32 %v3030_v6, %v3026_v5  ;;  %v3054_v18 = vmul.f32 0.9, %v3026_v5 }
 0x2f6   :  { %v3033_v11 = vadd.f32 %v3029_v8, %v3025_v7  ;;  %v3053_v21 = vmul.f32 0.9, %v3025_v7  ;;  %v3530_v7 = vld [vmem:[%s5188_s6] sm:$0xff]  ;;  %v3531_v8 = vld [vmem:[%s5188_s6 + $0x8] sm:$0xff] }
 0x2f7   :  { %v3038_v12 = vsub.f32 %v3034_v9, %v3956_v10  ;;  %v4197_v9 = vmov 0.0|0.0   ;;  %v4126_v10 = vpack.c.bf16 %v3531_v8, %v3530_v7 }
 0x2f8   :  { %v3037_v14 = vsub.f32 %v3033_v11, %v3955_v13  ;;  %v3532_v11 = vld [vmem:[%s5188_s6 + $0x10] sm:$0xff] }
 0x2f9   :  { %vm3042_vm14 = vcmp.gt.f32.partialorder %v3038_v12, 1.0  ;;  %v3062_v23 = vmul.f32 0.8, %v3038_v12  ;;  %v3533_v12 = vld [vmem:[%s5188_s6 + $0x18] sm:$0xff] }
 0x2fa   :  { %vm3041_vm15 = vcmp.gt.f32.partialorder %v3037_v14, 1.0  ;;  %v3061_v25 = vmul.f32 0.8, %v3037_v14  ;;  %v3960_v27 = vsel %vm3042_vm14, 1.0, %v4194_v17  ;;  %v4129_v13 = vpack.c.bf16 %v3533_v12, %v3532_v11  ;;  %v3534_v14 = vld [vmem:[%s5188_s6 + $0x20] sm:$0xff] }
 0x2fb   :  { %v3959_v30 = vsel %vm3041_vm15, 1.0, %v4194_v17 }
 0x310   :  { %v4077_v15 = vpop.f32.mrb[28].mxu0 }
 0x311   :  { %v2861_v16 = vadd.f32 %v4077_v15, %v4705_v57  ;;  %v2802_v19 = vpop.f32.mrb[29].mxu0  ;;  %v3535_v15 = vld [vmem:[%s5188_s6 + $0x28] sm:$0xff] }
 0x312   :  { %v2860_v20 = vadd.f32 %v4711_v58, %v2802_v19  ;;  %v3537_v19 = vld [vmem:[%s5188_s6 + $0x38] sm:$0xff] }
 0x313   :  { %v3058_v22 = vadd.f32 %v3054_v18, %v2861_v16  ;;  %v4132_v16 = vpack.c.bf16 %v3535_v15, %v3534_v14  ;;  %v3536_v18 = vld [vmem:[%s5188_s6 + $0x30] sm:$0xff] }
 0x314   :  { %v3057_v24 = vadd.f32 %v3053_v21, %v2860_v20  ;;  %v4135_v20 = vpack.c.bf16 %v3537_v19, %v3536_v18  ;;  %v3538_v21 = vld [vmem:[%s5188_s6 + $0x40] sm:$0xff] }
 0x315   :  { %v3066_v26 = vadd.f32 %v3062_v23, %v3058_v22  ;;  %v3086_v34 = vmul.f32 0.9, %v3058_v22  ;;  %v3539_v22 = vld [vmem:[%s5188_s6 + $0x48] sm:$0xff] }
 0x316   :  { %v3065_v28 = vadd.f32 %v3061_v25, %v3057_v24  ;;  %v3085_v37 = vmul.f32 0.9, %v3057_v24  ;;  %v4138_v23 = vpack.c.bf16 %v3539_v22, %v3538_v21  ;;  %v3540_v24 = vld [vmem:[%s5188_s6 + $0x50] sm:$0xff]  ;;  %v3541_v25 = vld [vmem:[%s5188_s6 + $0x58] sm:$0xff] }
 0x317   :  { %v3070_v29 = vsub.f32 %v3066_v26, %v3960_v27  ;;  %v4141_v26 = vpack.c.bf16 %v3541_v25, %v3540_v24  ;;  %v3542_v27 = vld [vmem:[%s5188_s6 + $0x60] sm:$0xff] }
 0x318   :  { %v3069_v31 = vsub.f32 %v3065_v28, %v3959_v30  ;;  %v3543_v28 = vld [vmem:[%s5188_s6 + $0x68] sm:$0xff]  ;;  %v3544_v30 = vld [vmem:[%s5188_s6 + $0x70] sm:$0xff] }
 0x319   :  { %vm3074_vm1 = vcmp.gt.f32.partialorder %v3070_v29, 1.0  ;;  %v3094_v39 = vmul.f32 0.8, %v3070_v29  ;;  %v4144_v29 = vpack.c.bf16 %v3543_v28, %v3542_v27 }
 0x31a   :  { %vm3073_vm4 = vcmp.gt.f32.partialorder %v3069_v31, 1.0  ;;  %v3093_v41 = vmul.f32 0.8, %v3069_v31  ;;  %v3964_v43 = vsel %vm3074_vm1, 1.0, %v4194_v17  ;;  %v3545_v31 = vld [vmem:[%s5188_s6 + $0x78] sm:$0xff] }
 0x31b   :  { %v3963_v46 = vsel %vm3073_vm4, 1.0, %v4194_v17 }
 0x32c   :  { %v4080_v32 = vpop.f32.mrb[30].mxu0 }
 0x32d   :  { %v2863_v33 = vadd.f32 %v4080_v32, %v4705_v57  ;;  %v2812_v35 = vpop.f32.mrb[31].mxu0  ;;  %v4147_v32 = vpack.c.bf16 %v3545_v31, %v3544_v30 }
 0x32e   :  { %v2862_v36 = vadd.f32 %v4711_v58, %v2812_v35 }
 0x32f   :  { %v3090_v38 = vadd.f32 %v3086_v34, %v2863_v33  ;;  %v3546_v33 = vld [vmem:[%s5188_s6 + $0x80] sm:$0xff]  ;;  %v3547_v34 = vld [vmem:[%s5188_s6 + $0x88] sm:$0xff] }
 0x330   :  { %v3089_v40 = vadd.f32 %v3085_v37, %v2862_v36  ;;  %v4150_v35 = vpack.c.bf16 %v3547_v34, %v3546_v33  ;;  %v3548_v36 = vld [vmem:[%s5188_s6 + $0x90] sm:$0xff]  ;;  %v3549_v37 = vld [vmem:[%s5188_s6 + $0x98] sm:$0xff] }
 0x331   :  { %v3098_v42 = vadd.f32 %v3094_v39, %v3090_v38  ;;  %v4153_v38 = vpack.c.bf16 %v3549_v37, %v3548_v36 }
 0x332   :  { %v3097_v44 = vadd.f32 %v3093_v41, %v3089_v40 }
 0x333   :  { %v3102_v45 = vsub.f32 %v3098_v42, %v3964_v43 }
 0x334   :  { %v3101_v47 = vsub.f32 %v3097_v44, %v3963_v46 }
 0x335   :  { %vm3106_vm5 = vcmp.gt.f32.partialorder %v3102_v45, 1.0 }
 0x336   :  { %v3968_v57 = vsel %vm3106_vm5, 1.0, %v4194_v17  ;;  %vm3105_vm6 = vcmp.gt.f32.partialorder %v3101_v47, 1.0 }
 0x337   :  { %v3967_v58 = vsel %vm3105_vm6, 1.0, %v4194_v17 }
 0x338   :  { %v4174_v48 = vpack.i.bf16 %v3968_v57, %v3967_v58 }
 0x33a   :  { %4175 = vrot.lane.b32.xlu0 %v4174_v48, %s4195_s0 }
 0x3ac   :  { %v4176_v50 = vpop.permute.xlu0 %4175 }
 0x3ad   :  { %v4178_v51 = vunpack.i.h.bf16 %v4176_v50  ;;  %v4177_v52 = vunpack.i.l.bf16 %v4176_v50 }
 0x3af   :  { %3128 = vst.msk [vmem:[#allocation3 + $0x8] sm:$0xff] %vm3126_vm2, %v4178_v51  ;;  %3127 = vst.msk [vmem:[#allocation3] sm:$0xff] %vm3126_vm2, %v4177_v52 }
 0x3b6   :  { %v3129_v17 = vld [vmem:[#allocation3] sm:$0xff]  ;;  %v3130_v53 = vld [vmem:[#allocation3 + $0x8] sm:$0xff] }
 0x3b7   :  { %3452 = vrot.lane.b32.xlu1 %v3129_v17, %s4185_s15  ;;  %v4109_v54 = vpack.c.bf16 %v3130_v53, %v3129_v17  ;;  %3448 = vst.msk [vmem:[#allocation4] sm:$0xff] %vm3115_vm3, %v3129_v17  ;;  %3449 = vst.msk [vmem:[#allocation4 + $0x10] sm:$0xff] %vm3115_vm3, %v3130_v53 }
 0x3b9   :  { %4110 = vmatprep.subr.bf16.mxu0 %v4109_v54 }
 0x3ba   :  { %4112 = vmatpush3.bf16.msra.mxu0 %v4109_v54 }
 0x3bd   :  { %4086 = vmatmul.mubr.msk.f32.vlgmr.msra.gmra.mrb[32].mxu0 %vm3135_vm0, %v3132_v55 }
 0x429   :  { %v3453_v56 = vpop.permute.xlu1 %3452 }
 0x42a   :  { %3458 = vst.msk [vmem:[#allocation4 + $0x20] sm:$0xff] %vm3115_vm3, %v3453_v56 }
 0x490   :  { %v5061_v59 = vpop.f32.mrb[32].mxu0 }
 0x491   :  { %v3208_v60 = vpop.f32.mrb[33].mxu0  ;;  %3464 = vrot.lane.b32.xlu0 %v5061_v59, %s4195_s0 }
 0x492   :  { %3470 = vst.msk [vmem:[#allocation4 + $0x20] sm:$0xff] %vm3126_vm2, %v3208_v60  ;;  %v4113_v61 = vpack.c.bf16 %v5061_v59, %v3208_v60  ;;  %3462 = vrot.lane.b32.xlu1 %v3208_v60, %s4195_s0 }
 0x494   :  { %4114 = vmatprep.subr.bf16.mxu1 %v4113_v61 }
 0x495   :  { %4116 = vmatpush3.bf16.msra.mxu1 %v4113_v61 }
 0x496   :  { %4118 = vmatprep.subr.bf16.mxu1 %v4109_v54 }
 0x498   :  { %4093 = vmatmul.mubr.msk.f32.vlgmr.msra.gmra.mrb[0].mxu1 %vm3135_vm0, %v3132_v55 }
 0x499   :  { %4120 = vmatpush3.bf16.msra.mxu1 %v4109_v54  ;;  %4099 = vmatprep.mubr.msk.f32.mxu1 %vm3135_vm0, %v3133_v62 }
 0x49c   :  { %4100 = vmatmul.mubr.msk.f32.vlgmr.msra.gmra.mrb[2].mxu1 %vm3135_vm0, %v3134_v63 }
 0x49d   :  { %4106 = vmatprep.mubr.msk.f32.mxu1 %vm3135_vm0, %v3133_v62 }
 0x503   :  { %v3465_v0 = vpop.permute.xlu0 %3464 }
 0x504   :  { %3469 = vst.msk [vmem:[#allocation4 + $0x10] sm:$0xff] %vm3126_vm2, %v3465_v0  ;;  %v3463_v1 = vpop.permute.xlu1 %3462 }
 0x505   :  { %3468 = vst.msk [vmem:[#allocation4] sm:$0xff] %vm3126_vm2, %v3463_v1 }
 0x56b   :  { %v4094_v2 = vpop.f32.mrb[0].mxu1 }
 0x56c   :  { %3476 = vrot.lane.b32.xlu1 %v4094_v2, %s4196_s17  ;;  %v3283_v3 = vpop.f32.mrb[1].mxu1 }
 0x56d   :  { %3474 = vrot.lane.b32.xlu0 %v3283_v3, %s4196_s17 }
 0x56f   :  { %v4101_v4 = vpop.f32.mrb[2].mxu1 }
 0x570   :  { %v3364_v5 = vpop.f32.mrb[3].mxu1 }
 0x571   :  { %v4121_v6 = vpack.c.bf16 %v4101_v4, %v3364_v5  ;;  %3493 = vrot.lane.b32.xlu1 %v3364_v5, %s4185_s15  ;;  %3483 = vrot.lane.b32.xlu0 %v3283_v3, %s4195_s0 }
 0x573   :  { %4122 = vmatprep.subr.bf16.mxu1 %v4121_v6 }
 0x574   :  { %4124 = vmatpush3.bf16.msra.mxu1 %v4121_v6 }
 0x575   :  { %3454 = vrot.lane.b32.xlu1 %v3130_v53, %s4185_s15  ;;  %3495 = vrot.lane.b32.xlu0 %v4101_v4, %s4185_s15 }
 0x576   :  { %4125 = vmatprep.subr.bf16.mxu1 %v4197_v9 }
 0x577   :  { %4107 = vmatmul.mubr.msk.f32.vlgmr.msra.gmra.mrb[4].mxu1 %vm3135_vm0, %v3134_v63 }
 0x578   :  { %4127 = vmatpush1.bf16.msra.mxu1 %v4126_v10 }
 0x579   :  { %3485 = vrot.lane.b32.xlu0 %v4094_v2, %s4195_s0  ;;  %4128 = vmatprep.subr.bf16.mxu1 %v4197_v9 }
 0x57c   :  { %4130 = vmatpush1.bf16.msra.mxu1 %v4129_v13 }
 0x57d   :  { %3502 = vrot.lane.b32.xlu0 %v3364_v5, %s4196_s17  ;;  %4131 = vmatprep.subr.bf16.mxu1 %v4197_v9 }
 0x580   :  { %4133 = vmatpush1.bf16.msra.mxu1 %v4132_v16 }
 0x581   :  { %3504 = vrot.lane.b32.xlu0 %v4101_v4, %s4196_s17  ;;  %4134 = vmatprep.subr.bf16.mxu1 %v4197_v9 }
 0x584   :  { %4136 = vmatpush1.bf16.msra.mxu1 %v4135_v20 }
 0x585   :  { %4137 = vmatprep.subr.bf16.mxu1 %v4197_v9 }
 0x588   :  { %4139 = vmatpush1.bf16.msra.mxu1 %v4138_v23 }
 0x589   :  { %4140 = vmatprep.subr.bf16.mxu1 %v4197_v9 }
 0x58c   :  { %4142 = vmatpush1.bf16.msra.mxu1 %v4141_v26 }
 0x58d   :  { %4143 = vmatprep.subr.bf16.mxu1 %v4197_v9 }
 0x590   :  { %4145 = vmatpush1.bf16.msra.mxu1 %v4144_v29 }
 0x591   :  { %4146 = vmatprep.subr.bf16.mxu1 %v4197_v9 }
 0x594   :  { %4148 = vmatpush1.bf16.msra.mxu1 %v4147_v32 }
 0x595   :  { %4149 = vmatprep.subr.bf16.mxu1 %v4197_v9 }
 0x598   :  { %4151 = vmatpush1.bf16.msra.mxu1 %v4150_v35 }
 0x599   :  { %4152 = vmatprep.subr.bf16.mxu1 %v4197_v9 }
 0x59c   :  { %4154 = vmatpush1.bf16.msra.mxu1 %v4153_v38 }
 0x5de   :  { %v3477_v39 = vpop.permute.xlu1 %3476 }
 0x5df   :  { %3482 = vst.msk [vmem:[#allocation4 + $0x10] sm:$0xff] %vm3480_vm7, %v3477_v39  ;;  %v3475_v40 = vpop.permute.xlu0 %3474 }
 0x5e0   :  { %3481 = vst.msk [vmem:[#allocation4] sm:$0xff] %vm3480_vm7, %v3475_v40 }
 0x5e3   :  { %v3494_v41 = vpop.permute.xlu1 %3493  ;;  %v3484_v42 = vpop.permute.xlu0 %3483 }
 0x5e4   :  { %3500 = vst.msk [vmem:[#allocation4] sm:$0xff] %vm3499_vm8, %v3494_v41 }
 0x5e5   :  { %3489 = vst.msk [vmem:[#allocation4 + $0x20] sm:$0xff] %vm3480_vm7, %v3484_v42 }
 0x5e7   :  { %v3455_v43 = vpop.permute.xlu1 %3454  ;;  %v3496_v44 = vpop.permute.xlu0 %3495 }
 0x5e8   :  { %3459 = vst.msk [vmem:[#allocation4 + $0x30] sm:$0xff] %vm3115_vm3, %v3455_v43 }
 0x5e9   :  { %3501 = vst.msk [vmem:[#allocation4 + $0x10] sm:$0xff] %vm3499_vm8, %v3496_v44 }
 0x5ea   :  { %3471 = vst.msk [vmem:[#allocation4 + $0x30] sm:$0xff] %vm3126_vm2, %v5061_v59  ;;  %v3977_v59 = vld [vmem:[%s5189_s7] ss:$0 sm:$0xff] }
 0x5eb   :  { %v3486_v45 = vpop.permute.xlu0 %3485  ;;  %v3522_v49 = vld [vmem:[#allocation4] sm:$0xff] }
 0x5ec   :  { %3490 = vst.msk [vmem:[#allocation4 + $0x30] sm:$0xff] %vm3480_vm7, %v3486_v45 }
 0x5ef   :  { %v3503_v46 = vpop.permute.xlu0 %3502 }
 0x5f0   :  { %3508 = vst.msk [vmem:[#allocation4 + $0x20] sm:$0xff] %vm3499_vm8, %v3503_v46  ;;  %v3524_v51 = vld [vmem:[#allocation4 + $0x10] sm:$0xff] }
 0x5f3   :  { %v3505_v47 = vpop.permute.xlu0 %3504 }
 0x5f4   :  { %3509 = vst.msk [vmem:[#allocation4 + $0x30] sm:$0xff] %vm3499_vm8, %v3505_v47 }
 0x5f7   :  { %v3526_v54 = vld [vmem:[#allocation4 + $0x20] sm:$0xff] }
 0x5fb   :  { %v3528_v56 = vld [vmem:[#allocation4 + $0x30] sm:$0xff] }
 0x64a   :  { %v4108_v57 = vpop.f32.mrb[4].mxu1 }
 0x64b   :  { %3511 = vst.msk [vmem:[#allocation4 + $0x18] sm:$0xff] %vm3115_vm3, %v4108_v57  ;;  %v3439_v58 = vpop.f32.mrb[5].mxu1 }
 0x64c   :  { %3510 = vst.msk [vmem:[#allocation4 + $0x8] sm:$0xff] %vm3115_vm3, %v3439_v58  ;;  %3514 = vrot.lane.b32.xlu1 %v3439_v58, %s4185_s15 }
 0x650   :  { %3516 = vrot.lane.b32.xlu1 %v4108_v57, %s4185_s15 }
 0x652   :  { %v3525_v50 = vld [vmem:[#allocation4 + $0x18] sm:$0xff] }
 0x653   :  { %v3523_v48 = vld [vmem:[#allocation4 + $0x8] sm:$0xff] }
 0x654   :  { %3978 = vmatprep.mubr.msk.f32.mxu1 %vm3115_vm3, %v3523_v48 }
 0x655   :  { %3634 = vmatmul.mubr.f32.vlgmr.msra.gmra.mrb[6].mxu1 %v3522_v49 }
 0x656   :  { %3979 = vmatprep.mubr.msk.f32.mxu1 %vm3115_vm3, %v3525_v50 }
 0x659   :  { %3639 = vmatmul.mubr.f32.gmra.mrb[8].mxu1 %v3524_v51 }
 0x6be   :  { %v3515_v52 = vpop.permute.xlu1 %3514 }
 0x6bf   :  { %3520 = vst.msk [vmem:[#allocation4 + $0x28] sm:$0xff] %vm3115_vm3, %v3515_v52 }
 0x6c2   :  { %v3517_v17 = vpop.permute.xlu1 %3516 }
 0x6c3   :  { %3521 = vst.msk [vmem:[#allocation4 + $0x38] sm:$0xff] %vm3115_vm3, %v3517_v17 }
 0x6c6   :  { %v3527_v53 = vld [vmem:[#allocation4 + $0x28] sm:$0xff] }
 0x6c7   :  { %3980 = vmatprep.mubr.msk.f32.mxu1 %vm3115_vm3, %v3527_v53 }
 0x6c8   :  { %3644 = vmatmul.mubr.f32.gmra.mrb[10].mxu1 %v3526_v54 }
 0x6ca   :  { %v3529_v55 = vld [vmem:[#allocation4 + $0x38] sm:$0xff] }
 0x6cb   :  { %3981 = vmatprep.mubr.msk.f32.mxu1 %vm3115_vm3, %v3529_v55 }
 0x6cc   :  { %3649 = vmatmul.mubr.f32.gmra.mrb[12].mxu1 %v3528_v56 }
 0x728   :  { %v3635_v60 = vpop.f32.mrb[6].mxu1 }
 0x729   :  { %v3636_v61 = vadd.f32 %v3977_v59, %v3635_v60  ;;  %v3637_v62 = vpop.f32.mrb[7].mxu1 }
 0x72b   :  { %3655 = vst.msk [vmem:[%s5190_s8] sm:$0xff] %vm3654_vm9, %v3636_v61 }
 0x72c   :  { %v3640_v63 = vpop.f32.mrb[8].mxu1 }
 0x72d   :  { %v3641_v0 = vadd.f32 %v3977_v59, %v3640_v63  ;;  %v3642_v1 = vpop.f32.mrb[9].mxu1 }
 0x72f   :  { %3656 = vst.msk [vmem:[%s5190_s8 + $0x8] sm:$0xff] %vm3654_vm9, %v3641_v0 }
 0x79b   :  { %v3645_v2 = vpop.f32.mrb[10].mxu1 }
 0x79c   :  { %v3646_v3 = vadd.f32 %v3977_v59, %v3645_v2  ;;  %v3647_v4 = vpop.f32.mrb[11].mxu1 }
 0x79e   :  { %3657 = vst.msk [vmem:[%s5190_s8 + $0x10] sm:$0xff] %vm3654_vm9, %v3646_v3 }
 0x79f   :  { %v3650_v5 = vpop.f32.mrb[12].mxu1 }
 0x7a0   :  { %v3651_v6 = vadd.f32 %v3977_v59, %v3650_v5  ;;  %v3652_v7 = vpop.f32.mrb[13].mxu1 }
 0x7a2   :  { %3658 = vst.msk [vmem:[%s5190_s8 + $0x18] sm:$0xff] %vm3654_vm9, %v3651_v6 }

</bundles_post_ra>
